<compile_context>
chip_gen: v7x
topology: tpu7x:2x2x1
jax: 0.10.0
libtpu: 0.0.40
codegen_flags: <defaults>
</compile_context>

<pallas_src>
import functools

import jax
import jax.numpy as jnp
from jax import lax
from jax.experimental import pallas as pl
from jax.experimental.pallas import tpu as pltpu

LN_EPS = 1e-5                 # torch.nn.LayerNorm default
_INV_SQRT2 = 0.7071067811865476


# ---------------------------------------------------------------------------
# small helpers
# ---------------------------------------------------------------------------
def _round_up(x, m):
    return (x + m - 1) // m * m


def _pick_tm(m, target=256):
    """Largest multiple-of-16 divisor of m that is <= target (token tile).
    m = B * N_pad is always a multiple of 16, so 16 is a valid fallback."""
    tm = 16
    for cand in range(16, min(m, target) + 1, 16):
        if m % cand == 0:
            tm = cand
    return tm


def _head_group(heads, hd):
    """Smallest G dividing `heads` with a lane-dense group width G*hd >= 128;
    falls back to all heads when D < 128 (tiny models)."""
    for g in range(1, heads + 1):
        if heads % g == 0 and g * hd >= 128:
            return g
    return heads


def _pad_rows(x, m_pad):
    m = x.shape[0]
    if m == m_pad:
        return x
    return jnp.pad(x, ((0, m_pad - m), (0, 0)))


def _gelu_exact(x):
    # nn.GELU() default: exact (erf-based) GELU, computed in f32.
    return 0.5 * x * (1.0 + lax.erf(x * _INV_SQRT2))


def _layer_norm(x, w, b):
    mu = jnp.mean(x, axis=-1, keepdims=True)
    var = jnp.mean((x - mu) ** 2, axis=-1, keepdims=True)
    return (x - mu) * lax.rsqrt(var + LN_EPS) * w + b


# ---------------------------------------------------------------------------
# generation-aware compiler params + single-buffered constant weight specs
# ---------------------------------------------------------------------------
_VMEM_LIMIT = None


def _vmem_limit_bytes():
    """Raise the scoped-VMEM limit above the small per-generation defaults
    (16 MiB on v5e / 32 MiB elsewhere), capped well below the physical part."""
    global _VMEM_LIMIT
    if _VMEM_LIMIT is None:
        try:
            cap = pltpu.get_tpu_info().vmem_capacity_bytes
            _VMEM_LIMIT = int(min(cap * 3 // 4, 96 << 20))
        except Exception:
            _VMEM_LIMIT = 32 << 20
    return _VMEM_LIMIT


def _cparams(*sems):
    return pltpu.CompilerParams(dimension_semantics=sems,
                                vmem_limit_bytes=_vmem_limit_bytes())


_WEIGHT_PM = None
_WEIGHT_PM_PROBED = False


def _weight_pipeline_mode():
    """pl.Buffered(1) for constant-index weight blocks when supported (halves
    their VMEM footprint vs. default double-buffering); otherwise default."""
    global _WEIGHT_PM, _WEIGHT_PM_PROBED
    if _WEIGHT_PM_PROBED:
        return _WEIGHT_PM
    try:
        def _probe(x_ref, w_ref, o_ref):
            o_ref[...] = x_ref[...] + w_ref[...]
        out = pl.pallas_call(
            _probe,
            grid=(2,),
            in_specs=[pl.BlockSpec((8, 128), lambda i: (i, 0)),
                      pl.BlockSpec((8, 128), lambda i: (0, 0),
                                   pipeline_mode=pl.Buffered(1))],
            out_specs=pl.BlockSpec((8, 128), lambda i: (i, 0)),
            out_shape=jax.ShapeDtypeStruct((16, 128), jnp.float32),
        )(jnp.zeros((16, 128), jnp.float32), jnp.ones((8, 128), jnp.float32))
        jax.block_until_ready(out)
        _WEIGHT_PM = pl.Buffered(1)
    except Exception:
        _WEIGHT_PM = None
    _WEIGHT_PM_PROBED = True
    return _WEIGHT_PM


def _weight_spec(shape, index_map):
    pm = _weight_pipeline_mode()
    if pm is None:
        return pl.BlockSpec(shape, index_map)
    return pl.BlockSpec(shape, index_map, pipeline_mode=pm)


# ----------------------------------------------------------------------------
# Patch embedding: stride=patch Conv2d == matmul over flattened (c, kh, kw)
# ----------------------------------------------------------------------------
def patch_embed_kernel(p_ref, w_ref, b_ref, o_ref):
    # cast the f32 patch tile to bf16 at the dot (rides the VPU under the MXU)
    o_ref[...] = (jnp.dot(p_ref[...].astype(jnp.bfloat16), w_ref[...],
                          preferred_element_type=jnp.float32) + b_ref[...])


def patch_embed(patches, w, b):
    M, K = patches.shape
    D = w.shape[1]
    TM = 256 if M >= 256 else _round_up(max(M, 16), 16)
    M_pad = _round_up(M, TM)
    patches = _pad_rows(patches, M_pad)
    out = pl.pallas_call(
        patch_embed_kernel,
        grid=(M_pad // TM,),
        in_specs=[pl.BlockSpec((TM, K), lambda i: (i, 0)),
                  _weight_spec((K, D), lambda i: (0, 0)),
                  _weight_spec((1, D), lambda i: (0, 0))],
        out_specs=pl.BlockSpec((TM, D), lambda i: (i, 0)),
        out_shape=jax.ShapeDtypeStruct((M_pad, D), jnp.float32),
        compiler_params=_cparams("parallel"),
    )(patches, w, b)
    return out[:M]


# ----------------------------------------------------------------------------
# Block sub-kernel 1: LayerNorm1 + fused QKV projection -> flat q/k/v buffers
# ----------------------------------------------------------------------------
def ln_qkv_kernel(x_ref, lw_ref, lb_ref, w_ref, b_ref, q_ref, k_ref, v_ref):
    xn = _layer_norm(x_ref[...], lw_ref[...], lb_ref[...])
    qkv = jnp.dot(xn.astype(jnp.bfloat16), w_ref[...],
                  preferred_element_type=jnp.float32) + b_ref[...]
    qkv = qkv.astype(jnp.bfloat16)
    d = q_ref.shape[-1]
    q_ref[...] = qkv[:, :d]
    k_ref[...] = qkv[:, d:2 * d]
    v_ref[...] = qkv[:, 2 * d:]


# ----------------------------------------------------------------------------
# Block sub-kernel 2: attention + output projection + residual, fused.
# grid = (batch, head_group); head_group is the K-reduction of the projection.
# ----------------------------------------------------------------------------
def attn_proj_kernel(q_ref, k_ref, v_ref, x_ref, wp_ref, bp_ref, o_ref,
                     acc_ref, *, G, hd, n_real, scale):
    hg = pl.program_id(1)

    @pl.when(hg == 0)
    def _():
        acc_ref[...] = jnp.zeros_like(acc_ref)

    n_pad = q_ref.shape[0]
    if n_pad > n_real:
        # mask padded key rows; padded-query rows stay garbage-but-finite and
        # never mix into real rows (they are sliced away at the end).
        col = lax.broadcasted_iota(jnp.int32, (1, n_pad), 1)
        key_bias = jnp.where(col < n_real, jnp.float32(0.0), jnp.float32(-1e30))
    else:
        key_bias = None

    o_parts = []
    for h in range(G):                       # unrolled head loop within group
        sl = pl.ds(h * hd, hd)
        qh = q_ref[:, sl] * scale            # fold softmax scale into q (bf16)
        s = lax.dot_general(qh, k_ref[:, sl], (((1,), (1,)), ((), ())),
                            preferred_element_type=jnp.float32)   # (N, N) f32
        if key_bias is not None:
            s = s + key_bias
        s = s - jnp.max(s, axis=-1, keepdims=True)
        p = jnp.exp(s)
        p = p * pl.reciprocal(jnp.sum(p, axis=-1, keepdims=True), approx=True)
        o_parts.append(jnp.dot(p.astype(jnp.bfloat16), v_ref[:, sl],
                               preferred_element_type=jnp.float32))
    o_grp = o_parts[0] if G == 1 else jnp.concatenate(o_parts, axis=-1)

    # fused output projection: accumulate this head group's K-slice of Wproj
    acc_ref[...] += jnp.dot(o_grp.astype(jnp.bfloat16), wp_ref[...],
                            preferred_element_type=jnp.float32)

    @pl.when(hg == pl.num_programs(1) - 1)
    def _():
        o_ref[...] = acc_ref[...] + bp_ref[...] + x_ref[...]


# ----------------------------------------------------------------------------
# Block sub-kernel 3: LayerNorm2 + MLP (GELU) + residual add
# ----------------------------------------------------------------------------
def ln_mlp_res_kernel(x_ref, lw_ref, lb_ref, w1_ref, b1_ref, w2_ref, b2_ref,
                      o_ref):
    x = x_ref[...]
    xn = _layer_norm(x, lw_ref[...], lb_ref[...])
    h = jnp.dot(xn.astype(jnp.bfloat16), w1_ref[...],
                preferred_element_type=jnp.float32) + b1_ref[...]
    h = _gelu_exact(h)
    y = jnp.dot(h.astype(jnp.bfloat16), w2_ref[...],
                preferred_element_type=jnp.float32) + b2_ref[...]
    o_ref[...] = x + y


def run_block(x, blk, *, B, N, N_pad, heads, TM):
    M, D = x.shape
    hd = D // heads
    scale = float(hd) ** -0.5
    d_ff = blk["w1"].shape[1]
    G = _head_group(heads, hd)          # heads per attention grid step
    HG = heads // G                     # number of head groups (reduction)
    Gh = G * hd                         # lane width of one head group
    grid_tok = (M // TM,)

    # ---- LN1 + fused QKV projection -> three flat (M, D) bf16 buffers ----
    q, k, v = pl.pallas_call(
        ln_qkv_kernel,
        grid=grid_tok,
        in_specs=[pl.BlockSpec((TM, D), lambda i: (i, 0)),
                  _weight_spec((1, D), lambda i: (0, 0)),
                  _weight_spec((1, D), lambda i: (0, 0)),
                  _weight_spec((D, 3 * D), lambda i: (0, 0)),
                  _weight_spec((1, 3 * D), lambda i: (0, 0))],
        out_specs=(pl.BlockSpec((TM, D), lambda i: (i, 0)),
                   pl.BlockSpec((TM, D), lambda i: (i, 0)),
                   pl.BlockSpec((TM, D), lambda i: (i, 0))),
        out_shape=(jax.ShapeDtypeStruct((M, D), jnp.bfloat16),
                   jax.ShapeDtypeStruct((M, D), jnp.bfloat16),
                   jax.ShapeDtypeStruct((M, D), jnp.bfloat16)),
        compiler_params=_cparams("parallel"),
    )(x, blk["ln1_w"], blk["ln1_b"], blk["wqkv"], blk["bqkv"])

    # ---- attention + projection + residual (no XLA glue, no HBM round-trip
    #      of the per-head attention output) -------------------------------
    x1 = pl.pallas_call(
        functools.partial(attn_proj_kernel, G=G, hd=hd, n_real=N, scale=scale),
        grid=(B, HG),
        in_specs=[pl.BlockSpec((N_pad, Gh), lambda b, g: (b, g)),
                  pl.BlockSpec((N_pad, Gh), lambda b, g: (b, g)),
                  pl.BlockSpec((N_pad, Gh), lambda b, g: (b, g)),
                  pl.BlockSpec((N_pad, D), lambda b, g: (b, 0)),
                  pl.BlockSpec((Gh, D), lambda b, g: (g, 0)),
                  _weight_spec((1, D), lambda b, g: (0, 0))],
        out_specs=pl.BlockSpec((N_pad, D), lambda b, g: (b, 0)),
        out_shape=jax.ShapeDtypeStruct((M, D), jnp.float32),
        scratch_shapes=[pltpu.VMEM((N_pad, D), jnp.float32)],
        compiler_params=_cparams("parallel", "arbitrary"),
    )(q, k, v, x, blk["wproj"], blk["bproj"])

    # ---- LN2 + MLP + residual --------------------------------------------
    x2 = pl.pallas_call(
        ln_mlp_res_kernel,
        grid=grid_tok,
        in_specs=[pl.BlockSpec((TM, D), lambda i: (i, 0)),
                  _weight_spec((1, D), lambda i: (0, 0)),
                  _weight_spec((1, D), lambda i: (0, 0)),
                  _weight_spec((D, d_ff), lambda i: (0, 0)),
                  _weight_spec((1, d_ff), lambda i: (0, 0)),
                  _weight_spec((d_ff, D), lambda i: (0, 0)),
                  _weight_spec((1, D), lambda i: (0, 0))],
        out_specs=pl.BlockSpec((TM, D), lambda i: (i, 0)),
        out_shape=jax.ShapeDtypeStruct((M, D), jnp.float32),
        compiler_params=_cparams("parallel"),
    )(x1, blk["ln2_w"], blk["ln2_b"], blk["w1"], blk["b1"],
      blk["w2"], blk["b2"])
    return x2


# ----------------------------------------------------------------------------
# Final norm + classification head on cls tokens only (LayerNorm is per-token,
# so norming just the cls rows is equivalent to norm(x)[:, 0]).
# ----------------------------------------------------------------------------
def head_kernel(c_ref, lw_ref, lb_ref, hw_ref, hb_ref, o_ref):
    cn = _layer_norm(c_ref[...], lw_ref[...], lb_ref[...])
    o_ref[...] = (jnp.dot(cn.astype(jnp.bfloat16), hw_ref[...],
                          preferred_element_type=jnp.float32) + hb_ref[...])


def run_head(cls_tok, params):
    B, D = cls_tok.shape
    n_cls = params["head_w"].shape[1]
    return pl.pallas_call(
        head_kernel,
        grid=(1,),
        in_specs=[pl.BlockSpec((B, D), lambda i: (0, 0)),
                  pl.BlockSpec((1, D), lambda i: (0, 0)),
                  pl.BlockSpec((1, D), lambda i: (0, 0)),
                  pl.BlockSpec((D, n_cls), lambda i: (0, 0)),
                  pl.BlockSpec((1, n_cls), lambda i: (0, 0))],
        out_specs=pl.BlockSpec((B, n_cls), lambda i: (0, 0)),
        out_shape=jax.ShapeDtypeStruct((B, n_cls), jnp.float32),
    )(cls_tok, params["ln_w"], params["ln_b"],
      params["head_w"], params["head_b"])


# ----------------------------------------------------------------------------
# Parameter construction (deterministic synthetic init mirroring init_weights).
# Matmul weights stored bf16; LN params / biases / embeddings stay f32.
# ----------------------------------------------------------------------------
def make_params(key, *, channels, patch, d_model, d_ff, heads, n_layers, n_cls,
                num_patches):
    keys = jax.random.split(key, 8 + 4 * n_layers)
    ki = iter(keys)

    def tn(shape, std=0.02):   # trunc_normal_(std=0.02) stand-in
        return (jax.random.normal(next(ki), shape, jnp.float32) * std)

    params = {
        # NOTE: conv-as-matmul weight must follow (in_ch, kh, kw) row order,
        # matching the patch-extraction transpose in vit_forward.
        "patch_w": tn((channels * patch * patch, d_model)).astype(jnp.bfloat16),
        "patch_b": jnp.zeros((1, d_model), jnp.float32),
        "cls_token": tn((1, 1, d_model)),
        "pos_embed": tn((1, num_patches + 1, d_model)),
        "ln_w": jnp.ones((1, d_model), jnp.float32),
        "ln_b": jnp.zeros((1, d_model), jnp.float32),
        "head_w": tn((d_model, n_cls)).astype(jnp.bfloat16),
        "head_b": jnp.zeros((1, n_cls), jnp.float32),
        "blocks": [],
    }
    for _ in range(n_layers):
        params["blocks"].append(dict(
            ln1_w=jnp.ones((1, d_model), jnp.float32),
            ln1_b=jnp.zeros((1, d_model), jnp.float32),
            wqkv=tn((d_model, 3 * d_model)).astype(jnp.bfloat16),
            bqkv=jnp.zeros((1, 3 * d_model), jnp.float32),
            wproj=tn((d_model, d_model)).astype(jnp.bfloat16),
            bproj=jnp.zeros((1, d_model), jnp.float32),
            ln2_w=jnp.ones((1, d_model), jnp.float32),
            ln2_b=jnp.zeros((1, d_model), jnp.float32),
            w1=tn((d_model, d_ff)).astype(jnp.bfloat16),
            b1=jnp.zeros((1, d_ff), jnp.float32),
            w2=tn((d_ff, d_model)).astype(jnp.bfloat16),
            b2=jnp.zeros((1, d_model), jnp.float32),
        ))
    return params


# ----------------------------------------------------------------------------
# Full forward
# ----------------------------------------------------------------------------
def vit_forward(im, params, *, patch, heads, d_model):
    B, C, H, W = im.shape
    gh, gw = H // patch, W // patch
    Np = gh * gw
    N = Np + 1
    N_pad = _round_up(N, 16)     # per-batch token rows, sublane-tile aligned

    # one-time glue: extract non-overlapping patches in (c, kh, kw) order
    p = im.reshape(B, C, gh, patch, gw, patch)
    p = p.transpose(0, 2, 4, 1, 3, 5).reshape(B * Np, C * patch * patch)

    tokens = patch_embed(p, params["patch_w"], params["patch_b"])
    tokens = tokens.reshape(B, Np, d_model)

    cls = jnp.broadcast_to(params["cls_token"], (B, 1, d_model))
    x = jnp.concatenate([cls, tokens], axis=1) + params["pos_embed"]  # (B,N,D)
    # dropout: identity (eval mode)

    # flat, lane-dense residual stream; padded ONCE (per batch) to N_pad rows
    x = jnp.pad(x, ((0, 0), (0, N_pad - N), (0, 0))).reshape(B * N_pad, d_model)

    TM = _pick_tm(B * N_pad)
    # TODO(synk): per-layer weights could be cross-pallas_call prefetched (or
    # stacked on a layer grid axis) to hide their DMA behind the previous
    # layer's compute; kept as per-layer pipelined calls here.
    # TODO(synk): on v7x, fp8 weight storage with per-channel scales would
    # halve weight HBM/VMEM traffic; needs a quantization/accuracy pass.
    for blk in params["blocks"]:
        x = run_block(x, blk, B=B, N=N, N_pad=N_pad, heads=heads, TM=TM)

    cls_tok = x.reshape(B, N_pad, d_model)[:, 0, :]
    return run_head(cls_tok, params)                    # (B, n_cls)


if __name__ == "__main__":
    key = jax.random.PRNGKey(0)
    kx, kp = jax.random.split(key)

    # small config consistent with the module
    B, C, H, W = 2, 3, 16, 16
    patch, d_model, d_ff, heads, n_layers, n_cls = 4, 32, 64, 4, 2, 10

    im = jax.random.normal(kx, (B, C, H, W), jnp.float32)
    params = make_params(kp, channels=C, patch=patch, d_model=d_model,
                         d_ff=d_ff, heads=heads, n_layers=n_layers,
                         n_cls=n_cls, num_patches=(H // patch) * (W // patch))

    _weight_pipeline_mode()   # probe pl.Buffered(1) support once, outside jit
    _vmem_limit_bytes()       # query VMEM capacity once, outside jit

    fwd = jax.jit(functools.partial(vit_forward, patch=patch, heads=heads,
                                    d_model=d_model))
    out = fwd(im, params)
    jax.block_until_ready(out)
    assert out.shape == (B, n_cls) and out.dtype == jnp.float32
    assert bool(jnp.all(jnp.isfinite(out)))
    print("KERNEL_OK")
</pallas_src>

<mosaic_0001>
module attributes {stable_mosaic.version = 11 : i64} {
  func.func @_probe(%arg0: i32, %arg1: memref<8x128xf32, #tpu.memory_space<vmem>>, %arg2: memref<8x128xf32, #tpu.memory_space<vmem>>, %arg3: memref<8x128xf32, #tpu.memory_space<vmem>>) attributes {dimension_semantics = [#tpu.dimension_semantics<arbitrary>], iteration_bounds = array<i64: 2>, scalar_prefetch = 0 : i64, scratch_operands = 0 : i64, tpu.core_type = #tpu.core_type<tc>, window_params = [{transform_indices = @transform_0, window_bounds = array<i64: 8, 128>}, {pipeline_mode = #tpu.pipeline_mode<synchronous>, transform_indices = @transform_1, window_bounds = array<i64: 8, 128>}, {transform_indices = @transform_2, window_bounds = array<i64: 8, 128>}]} {
    %c0 = arith.constant 0 : index
    %c0_0 = arith.constant 0 : index
    %0 = vector.load %arg1[%c0, %c0_0] : memref<8x128xf32, #tpu.memory_space<vmem>>, vector<8x128xf32>
    %c0_1 = arith.constant 0 : index
    %c0_2 = arith.constant 0 : index
    %1 = vector.load %arg2[%c0_1, %c0_2] : memref<8x128xf32, #tpu.memory_space<vmem>>, vector<8x128xf32>
    %2 = arith.addf %0, %1 : vector<8x128xf32>
    %c0_3 = arith.constant 0 : index
    %c0_4 = arith.constant 0 : index
    %3 = vector.load %arg3[%c0_3, %c0_4] : memref<8x128xf32, #tpu.memory_space<vmem>>, vector<8x128xf32>
    tpu.vector_store %arg3[%c0_3, %c0_4], %2 {strides = array<i32>} : memref<8x128xf32, #tpu.memory_space<vmem>>, vector<8x128xf32>,
    return
  }
  func.func @transform_0(%arg0: i32) -> (i32, i32) {
    %c0_i32 = arith.constant 0 : i32
    %c0_i32_0 = arith.constant 0 : i32
    return %arg0, %c0_i32 : i32, i32
  }
  func.func @transform_1(%arg0: i32) -> (i32, i32) {
    %c0_i32 = arith.constant 0 : i32
    %c0_i32_0 = arith.constant 0 : i32
    %c0_i32_1 = arith.constant 0 : i32
    return %c0_i32, %c0_i32_0 : i32, i32
  }
  func.func @transform_2(%arg0: i32) -> (i32, i32) {
    %c0_i32 = arith.constant 0 : i32
    %c0_i32_0 = arith.constant 0 : i32
    return %arg0, %c0_i32 : i32, i32
  }
}

module attributes {stable_mosaic.version = 11 : i64} {
  func.func @patch_embed_kernel(%arg0: i32, %arg1: memref<32x48xf32, #tpu.memory_space<vmem>>, %arg2: memref<48x32xbf16, #tpu.memory_space<vmem>>, %arg3: memref<1x32xf32, #tpu.memory_space<vmem>>, %arg4: memref<32x32xf32, #tpu.memory_space<vmem>>) attributes {dimension_semantics = [#tpu.dimension_semantics<parallel>], iteration_bounds = array<i64: 1>, scalar_prefetch = 0 : i64, scratch_operands = 0 : i64, tpu.core_type = #tpu.core_type<tc>, window_params = [{transform_indices = @transform_0, window_bounds = array<i64: 32, 48>}, {pipeline_mode = #tpu.pipeline_mode<synchronous>, transform_indices = @transform_1, window_bounds = array<i64: 48, 32>}, {pipeline_mode = #tpu.pipeline_mode<synchronous>, transform_indices = @transform_2, window_bounds = array<i64: 1, 32>}, {transform_indices = @transform_3, window_bounds = array<i64: 32, 32>}]} {
    %c0 = arith.constant 0 : index
    %c0_0 = arith.constant 0 : index
    %0 = vector.load %arg1[%c0, %c0_0] : memref<32x48xf32, #tpu.memory_space<vmem>>, vector<32x48xf32>
    %1 = arith.truncf %0 : vector<32x48xf32> to vector<32x48xbf16>
    %c0_1 = arith.constant 0 : index
    %c0_2 = arith.constant 0 : index
    %2 = vector.load %arg2[%c0_1, %c0_2] : memref<48x32xbf16, #tpu.memory_space<vmem>>, vector<48x32xbf16>
    %cst = arith.constant dense<0.000000e+00> : vector<32x32xf32>
    %3 = tpu.matmul %1, %2, %cst {dimension_numbers = #tpu.dot_dimension_numbers<[1], [0], [0], [1], [0, 0, 1, 1], [], []>} : vector<32x48xbf16>, vector<48x32xbf16>, vector<32x32xf32> -> vector<32x32xf32>
    %c0_3 = arith.constant 0 : index
    %c0_4 = arith.constant 0 : index
    %4 = vector.load %arg3[%c0_3, %c0_4] : memref<1x32xf32, #tpu.memory_space<vmem>>, vector<1x32xf32>
    %5 = vector.broadcast %4 : vector<1x32xf32> to vector<32x32xf32>
    %6 = arith.addf %3, %5 : vector<32x32xf32>
    %c0_5 = arith.constant 0 : index
    %c0_6 = arith.constant 0 : index
    %7 = vector.load %arg4[%c0_5, %c0_6] : memref<32x32xf32, #tpu.memory_space<vmem>>, vector<32x32xf32>
    tpu.vector_store %arg4[%c0_5, %c0_6], %6 {strides = array<i32>} : memref<32x32xf32, #tpu.memory_space<vmem>>, vector<32x32xf32>,
    return
  }
  func.func @transform_0(%arg0: i32) -> (i32, i32) {
    %c0_i32 = arith.constant 0 : i32
    %c0_i32_0 = arith.constant 0 : i32
    return %arg0, %c0_i32 : i32, i32
  }
  func.func @transform_1(%arg0: i32) -> (i32, i32) {
    %c0_i32 = arith.constant 0 : i32
    %c0_i32_0 = arith.constant 0 : i32
    %c0_i32_1 = arith.constant 0 : i32
    return %c0_i32, %c0_i32_0 : i32, i32
  }
  func.func @transform_2(%arg0: i32) -> (i32, i32) {
    %c0_i32 = arith.constant 0 : i32
    %c0_i32_0 = arith.constant 0 : i32
    %c0_i32_1 = arith.constant 0 : i32
    return %c0_i32, %c0_i32_0 : i32, i32
  }
  func.func @transform_3(%arg0: i32) -> (i32, i32) {
    %c0_i32 = arith.constant 0 : i32
    %c0_i32_0 = arith.constant 0 : i32
    return %arg0, %c0_i32 : i32, i32
  }
}

module attributes {stable_mosaic.version = 11 : i64} {
  func.func @ln_qkv_kernel(%arg0: i32, %arg1: memref<64x32xf32, #tpu.memory_space<vmem>>, %arg2: memref<1x32xf32, #tpu.memory_space<vmem>>, %arg3: memref<1x32xf32, #tpu.memory_space<vmem>>, %arg4: memref<32x96xbf16, #tpu.memory_space<vmem>>, %arg5: memref<1x96xf32, #tpu.memory_space<vmem>>, %arg6: memref<64x32xbf16, #tpu.memory_space<vmem>>, %arg7: memref<64x32xbf16, #tpu.memory_space<vmem>>, %arg8: memref<64x32xbf16, #tpu.memory_space<vmem>>) attributes {dimension_semantics = [#tpu.dimension_semantics<parallel>], iteration_bounds = array<i64: 1>, scalar_prefetch = 0 : i64, scratch_operands = 0 : i64, tpu.core_type = #tpu.core_type<tc>, window_params = [{transform_indices = @transform_0, window_bounds = array<i64: 64, 32>}, {pipeline_mode = #tpu.pipeline_mode<synchronous>, transform_indices = @transform_1, window_bounds = array<i64: 1, 32>}, {pipeline_mode = #tpu.pipeline_mode<synchronous>, transform_indices = @transform_2, window_bounds = array<i64: 1, 32>}, {pipeline_mode = #tpu.pipeline_mode<synchronous>, transform_indices = @transform_3, window_bounds = array<i64: 32, 96>}, {pipeline_mode = #tpu.pipeline_mode<synchronous>, transform_indices = @transform_4, window_bounds = array<i64: 1, 96>}, {transform_indices = @transform_5, window_bounds = array<i64: 64, 32>}, {transform_indices = @transform_6, window_bounds = array<i64: 64, 32>}, {transform_indices = @transform_7, window_bounds = array<i64: 64, 32>}]} {
    %c0 = arith.constant 0 : index
    %c0_0 = arith.constant 0 : index
    %0 = vector.load %arg1[%c0, %c0_0] : memref<64x32xf32, #tpu.memory_space<vmem>>, vector<64x32xf32>
    %c0_1 = arith.constant 0 : index
    %c0_2 = arith.constant 0 : index
    %1 = vector.load %arg2[%c0_1, %c0_2] : memref<1x32xf32, #tpu.memory_space<vmem>>, vector<1x32xf32>
    %c0_3 = arith.constant 0 : index
    %c0_4 = arith.constant 0 : index
    %2 = vector.load %arg3[%c0_3, %c0_4] : memref<1x32xf32, #tpu.memory_space<vmem>>, vector<1x32xf32>
    %cst = arith.constant dense<0.000000e+00> : vector<64xf32>
    %3 = vector.multi_reduction <add>, %0, %cst [1] : vector<64x32xf32> to vector<64xf32>
    %4 = vector.shape_cast %3 : vector<64xf32> to vector<64x1xf32>
    %cst_5 = arith.constant 3.200000e+01 : f32
    %5 = vector.broadcast %cst_5 : f32 to vector<64x1xf32>
    %6 = arith.divf %4, %5 : vector<64x1xf32>
    %7 = vector.broadcast %6 : vector<64x1xf32> to vector<64x32xf32>
    %8 = arith.subf %0, %7 : vector<64x32xf32>
    %9 = arith.mulf %8, %8 : vector<64x32xf32>
    %cst_6 = arith.constant dense<0.000000e+00> : vector<64xf32>
    %10 = vector.multi_reduction <add>, %9, %cst_6 [1] : vector<64x32xf32> to vector<64xf32>
    %11 = vector.shape_cast %10 : vector<64xf32> to vector<64x1xf32>
    %cst_7 = arith.constant 3.200000e+01 : f32
    %12 = vector.broadcast %cst_7 : f32 to vector<64x1xf32>
    %13 = arith.divf %11, %12 : vector<64x1xf32>
    %14 = vector.broadcast %6 : vector<64x1xf32> to vector<64x32xf32>
    %15 = arith.subf %0, %14 : vector<64x32xf32>
    %cst_8 = arith.constant 9.99999974E-6 : f32
    %16 = vector.broadcast %cst_8 : f32 to vector<64x1xf32>
    %17 = arith.addf %13, %16 : vector<64x1xf32>
    %18 = math.rsqrt %17 : vector<64x1xf32>
    %19 = vector.broadcast %18 : vector<64x1xf32> to vector<64x32xf32>
    %20 = arith.mulf %15, %19 : vector<64x32xf32>
    %21 = vector.broadcast %1 : vector<1x32xf32> to vector<64x32xf32>
    %22 = arith.mulf %20, %21 : vector<64x32xf32>
    %23 = vector.broadcast %2 : vector<1x32xf32> to vector<64x32xf32>
    %24 = arith.addf %22, %23 : vector<64x32xf32>
    %25 = arith.truncf %24 : vector<64x32xf32> to vector<64x32xbf16>
    %c0_9 = arith.constant 0 : index
    %c0_10 = arith.constant 0 : index
    %26 = vector.load %arg4[%c0_9, %c0_10] : memref<32x96xbf16, #tpu.memory_space<vmem>>, vector<32x96xbf16>
    %cst_11 = arith.constant dense<0.000000e+00> : vector<64x96xf32>
    %27 = tpu.matmul %25, %26, %cst_11 {dimension_numbers = #tpu.dot_dimension_numbers<[1], [0], [0], [1], [0, 0, 1, 1], [], []>} : vector<64x32xbf16>, vector<32x96xbf16>, vector<64x96xf32> -> vector<64x96xf32>
    %c0_12 = arith.constant 0 : index
    %c0_13 = arith.constant 0 : index
    %28 = vector.load %arg5[%c0_12, %c0_13] : memref<1x96xf32, #tpu.memory_space<vmem>>, vector<1x96xf32>
    %29 = vector.broadcast %28 : vector<1x96xf32> to vector<64x96xf32>
    %30 = arith.addf %27, %29 : vector<64x96xf32>
    %31 = arith.truncf %30 : vector<64x96xf32> to vector<64x96xbf16>
    %32 = vector.extract_strided_slice %31 {offsets = [0, 0], sizes = [64, 32], strides = [1, 1]} : vector<64x96xbf16> to vector<64x32xbf16>
    %c0_14 = arith.constant 0 : index
    %c0_15 = arith.constant 0 : index
    %33 = vector.load %arg6[%c0_14, %c0_15] : memref<64x32xbf16, #tpu.memory_space<vmem>>, vector<64x32xbf16>
    tpu.vector_store %arg6[%c0_14, %c0_15], %32 {strides = array<i32>} : memref<64x32xbf16, #tpu.memory_space<vmem>>, vector<64x32xbf16>,
    %34 = vector.extract_strided_slice %31 {offsets = [0, 32], sizes = [64, 32], strides = [1, 1]} : vector<64x96xbf16> to vector<64x32xbf16>
    %c0_16 = arith.constant 0 : index
    %c0_17 = arith.constant 0 : index
    %35 = vector.load %arg7[%c0_16, %c0_17] : memref<64x32xbf16, #tpu.memory_space<vmem>>, vector<64x32xbf16>
    tpu.vector_store %arg7[%c0_16, %c0_17], %34 {strides = array<i32>} : memref<64x32xbf16, #tpu.memory_space<vmem>>, vector<64x32xbf16>,
    %36 = vector.extract_strided_slice %31 {offsets = [0, 64], sizes = [64, 32], strides = [1, 1]} : vector<64x96xbf16> to vector<64x32xbf16>
    %c0_18 = arith.constant 0 : index
    %c0_19 = arith.constant 0 : index
    %37 = vector.load %arg8[%c0_18, %c0_19] : memref<64x32xbf16, #tpu.memory_space<vmem>>, vector<64x32xbf16>
    tpu.vector_store %arg8[%c0_18, %c0_19], %36 {strides = array<i32>} : memref<64x32xbf16, #tpu.memory_space<vmem>>, vector<64x32xbf16>,
    return
  }
  func.func @transform_0(%arg0: i32) -> (i32, i32) {
    %c0_i32 = arith.constant 0 : i32
    %c0_i32_0 = arith.constant 0 : i32
    return %arg0, %c0_i32 : i32, i32
  }
  func.func @transform_1(%arg0: i32) -> (i32, i32) {
    %c0_i32 = arith.constant 0 : i32
    %c0_i32_0 = arith.constant 0 : i32
    %c0_i32_1 = arith.constant 0 : i32
    return %c0_i32, %c0_i32_0 : i32, i32
  }
  func.func @transform_2(%arg0: i32) -> (i32, i32) {
    %c0_i32 = arith.constant 0 : i32
    %c0_i32_0 = arith.constant 0 : i32
    %c0_i32_1 = arith.constant 0 : i32
    return %c0_i32, %c0_i32_0 : i32, i32
  }
  func.func @transform_3(%arg0: i32) -> (i32, i32) {
    %c0_i32 = arith.constant 0 : i32
    %c0_i32_0 = arith.constant 0 : i32
    %c0_i32_1 = arith.constant 0 : i32
    return %c0_i32, %c0_i32_0 : i32, i32
  }
  func.func @transform_4(%arg0: i32) -> (i32, i32) {
    %c0_i32 = arith.constant 0 : i32
    %c0_i32_0 = arith.constant 0 : i32
    %c0_i32_1 = arith.constant 0 : i32
    return %c0_i32, %c0_i32_0 : i32, i32
  }
  func.func @transform_5(%arg0: i32) -> (i32, i32) {
    %c0_i32 = arith.constant 0 : i32
    %c0_i32_0 = arith.constant 0 : i32
    return %arg0, %c0_i32 : i32, i32
  }
  func.func @transform_6(%arg0: i32) -> (i32, i32) {
    %c0_i32 = arith.constant 0 : i32
    %c0_i32_0 = arith.constant 0 : i32
    return %arg0, %c0_i32 : i32, i32
  }
  func.func @transform_7(%arg0: i32) -> (i32, i32) {
    %c0_i32 = arith.constant 0 : i32
    %c0_i32_0 = arith.constant 0 : i32
    return %arg0, %c0_i32 : i32, i32
  }
}

module attributes {stable_mosaic.version = 11 : i64} {
  func.func @attn_proj_kernel(%arg0: i32, %arg1: i32, %arg2: memref<32x32xbf16, #tpu.memory_space<vmem>>, %arg3: memref<32x32xbf16, #tpu.memory_space<vmem>>, %arg4: memref<32x32xbf16, #tpu.memory_space<vmem>>, %arg5: memref<32x32xf32, #tpu.memory_space<vmem>>, %arg6: memref<32x32xbf16, #tpu.memory_space<vmem>>, %arg7: memref<1x32xf32, #tpu.memory_space<vmem>>, %arg8: memref<32x32xf32, #tpu.memory_space<vmem>>, %arg9: memref<32x32xf32, #tpu.memory_space<vmem>>) attributes {dimension_semantics = [#tpu.dimension_semantics<parallel>, #tpu.dimension_semantics<arbitrary>], iteration_bounds = array<i64: 2, 1>, scalar_prefetch = 0 : i64, scratch_operands = 1 : i64, tpu.core_type = #tpu.core_type<tc>, window_params = [{transform_indices = @transform_0, window_bounds = array<i64: 32, 32>}, {transform_indices = @transform_1, window_bounds = array<i64: 32, 32>}, {transform_indices = @transform_2, window_bounds = array<i64: 32, 32>}, {transform_indices = @transform_3, window_bounds = array<i64: 32, 32>}, {transform_indices = @transform_4, window_bounds = array<i64: 32, 32>}, {pipeline_mode = #tpu.pipeline_mode<synchronous>, transform_indices = @transform_5, window_bounds = array<i64: 1, 32>}, {transform_indices = @transform_6, window_bounds = array<i64: 32, 32>}]} {
    %c0_i32 = arith.constant 0 : i32
    %0 = arith.cmpi eq, %arg1, %c0_i32 : i32
    %1 = arith.extui %0 : i1 to i32
    %c0_i32_0 = arith.constant 0 : i32
    %2 = arith.cmpi ne, %1, %c0_i32_0 : i32
    scf.if %2 {
      %cst_51 = arith.constant 0.000000e+00 : f32
      %99 = vector.broadcast %cst_51 : f32 to vector<32x32xf32>
      %c0_52 = arith.constant 0 : index
      %c0_53 = arith.constant 0 : index
      %100 = vector.load %arg9[%c0_52, %c0_53] : memref<32x32xf32, #tpu.memory_space<vmem>>, vector<32x32xf32>
      tpu.vector_store %arg9[%c0_52, %c0_53], %99 {strides = array<i32>} : memref<32x32xf32, #tpu.memory_space<vmem>>, vector<32x32xf32>,
    } else {
    }
    %3 = tpu.iota {dimensions = array<i32: 1>} : vector<1x32xi32>
    %c17_i32 = arith.constant 17 : i32
    %4 = vector.broadcast %c17_i32 : i32 to vector<1x32xi32>
    %5 = arith.cmpi slt, %3, %4 : vector<1x32xi32>
    %cst = arith.constant 0.000000e+00 : f32
    %cst_1 = arith.constant -1.000000e+30 : f32
    %6 = vector.broadcast %cst : f32 to vector<1x32xf32>
    %7 = vector.broadcast %cst_1 : f32 to vector<1x32xf32>
    %8 = arith.select %5, %6, %7 : vector<1x32xi1>, vector<1x32xf32>
    %c0 = arith.constant 0 : index
    %c0_2 = arith.constant 0 : index
    %9 = vector.load %arg2[%c0, %c0_2] : memref<32x32xbf16, #tpu.memory_space<vmem>>, vector<32x8xbf16>
    %cst_3 = arith.constant 3.535160e-01 : bf16
    %10 = vector.broadcast %cst_3 : bf16 to vector<32x8xbf16>
    %11 = arith.mulf %9, %10 : vector<32x8xbf16>
    %c0_4 = arith.constant 0 : index
    %c0_5 = arith.constant 0 : index
    %12 = vector.load %arg3[%c0_4, %c0_5] : memref<32x32xbf16, #tpu.memory_space<vmem>>, vector<32x8xbf16>
    %cst_6 = arith.constant dense<0.000000e+00> : vector<32x32xf32>
    %13 = tpu.matmul %11, %12, %cst_6 {dimension_numbers = #tpu.dot_dimension_numbers<[1], [1], [0], [0], [0, 0, 1, 0], [], []>} : vector<32x8xbf16>, vector<32x8xbf16>, vector<32x32xf32> -> vector<32x32xf32>
    %14 = vector.broadcast %8 : vector<1x32xf32> to vector<32x32xf32>
    %15 = arith.addf %13, %14 : vector<32x32xf32>
    %cst_7 = arith.constant dense<0xFF800000> : vector<32xf32>
    %16 = vector.multi_reduction <maximumf>, %15, %cst_7 [1] : vector<32x32xf32> to vector<32xf32>
    %17 = vector.shape_cast %16 : vector<32xf32> to vector<32x1xf32>
    %18 = vector.broadcast %17 : vector<32x1xf32> to vector<32x32xf32>
    %19 = arith.subf %15, %18 : vector<32x32xf32>
    %20 = math.exp %19 : vector<32x32xf32>
    %cst_8 = arith.constant dense<0.000000e+00> : vector<32xf32>
    %21 = vector.multi_reduction <add>, %20, %cst_8 [1] : vector<32x32xf32> to vector<32xf32>
    %22 = vector.shape_cast %21 : vector<32xf32> to vector<32x1xf32>
    %23 = tpu.reciprocal %22 {approx = true} : vector<32x1xf32> -> vector<32x1xf32>
    %24 = vector.broadcast %23 : vector<32x1xf32> to vector<32x32xf32>
    %25 = arith.mulf %20, %24 : vector<32x32xf32>
    %26 = arith.truncf %25 : vector<32x32xf32> to vector<32x32xbf16>
    %c0_9 = arith.constant 0 : index
    %c0_10 = arith.constant 0 : index
    %27 = vector.load %arg4[%c0_9, %c0_10] : memref<32x32xbf16, #tpu.memory_space<vmem>>, vector<32x8xbf16>
    %cst_11 = arith.constant dense<0.000000e+00> : vector<32x8xf32>
    %28 = tpu.matmul %26, %27, %cst_11 {dimension_numbers = #tpu.dot_dimension_numbers<[1], [0], [0], [1], [0, 0, 1, 1], [], []>} : vector<32x32xbf16>, vector<32x8xbf16>, vector<32x8xf32> -> vector<32x8xf32>
    %c0_12 = arith.constant 0 : index
    %c8 = arith.constant 8 : index
    %29 = vector.load %arg2[%c0_12, %c8] : memref<32x32xbf16, #tpu.memory_space<vmem>>, vector<32x8xbf16>
    %cst_13 = arith.constant 3.535160e-01 : bf16
    %30 = vector.broadcast %cst_13 : bf16 to vector<32x8xbf16>
    %31 = arith.mulf %29, %30 : vector<32x8xbf16>
    %c0_14 = arith.constant 0 : index
    %c8_15 = arith.constant 8 : index
    %32 = vector.load %arg3[%c0_14, %c8_15] : memref<32x32xbf16, #tpu.memory_space<vmem>>, vector<32x8xbf16>
    %cst_16 = arith.constant dense<0.000000e+00> : vector<32x32xf32>
    %33 = tpu.matmul %31, %32, %cst_16 {dimension_numbers = #tpu.dot_dimension_numbers<[1], [1], [0], [0], [0, 0, 1, 0], [], []>} : vector<32x8xbf16>, vector<32x8xbf16>, vector<32x32xf32> -> vector<32x32xf32>
    %34 = vector.broadcast %8 : vector<1x32xf32> to vector<32x32xf32>
    %35 = arith.addf %33, %34 : vector<32x32xf32>
    %cst_17 = arith.constant dense<0xFF800000> : vector<32xf32>
    %36 = vector.multi_reduction <maximumf>, %35, %cst_17 [1] : vector<32x32xf32> to vector<32xf32>
    %37 = vector.shape_cast %36 : vector<32xf32> to vector<32x1xf32>
    %38 = vector.broadcast %37 : vector<32x1xf32> to vector<32x32xf32>
    %39 = arith.subf %35, %38 : vector<32x32xf32>
    %40 = math.exp %39 : vector<32x32xf32>
    %cst_18 = arith.constant dense<0.000000e+00> : vector<32xf32>
    %41 = vector.multi_reduction <add>, %40, %cst_18 [1] : vector<32x32xf32> to vector<32xf32>
    %42 = vector.shape_cast %41 : vector<32xf32> to vector<32x1xf32>
    %43 = tpu.reciprocal %42 {approx = true} : vector<32x1xf32> -> vector<32x1xf32>
    %44 = vector.broadcast %43 : vector<32x1xf32> to vector<32x32xf32>
    %45 = arith.mulf %40, %44 : vector<32x32xf32>
    %46 = arith.truncf %45 : vector<32x32xf32> to vector<32x32xbf16>
    %c0_19 = arith.constant 0 : index
    %c8_20 = arith.constant 8 : index
    %47 = vector.load %arg4[%c0_19, %c8_20] : memref<32x32xbf16, #tpu.memory_space<vmem>>, vector<32x8xbf16>
    %cst_21 = arith.constant dense<0.000000e+00> : vector<32x8xf32>
    %48 = tpu.matmul %46, %47, %cst_21 {dimension_numbers = #tpu.dot_dimension_numbers<[1], [0], [0], [1], [0, 0, 1, 1], [], []>} : vector<32x32xbf16>, vector<32x8xbf16>, vector<32x8xf32> -> vector<32x8xf32>
    %c0_22 = arith.constant 0 : index
    %c16 = arith.constant 16 : index
    %49 = vector.load %arg2[%c0_22, %c16] : memref<32x32xbf16, #tpu.memory_space<vmem>>, vector<32x8xbf16>
    %cst_23 = arith.constant 3.535160e-01 : bf16
    %50 = vector.broadcast %cst_23 : bf16 to vector<32x8xbf16>
    %51 = arith.mulf %49, %50 : vector<32x8xbf16>
    %c0_24 = arith.constant 0 : index
    %c16_25 = arith.constant 16 : index
    %52 = vector.load %arg3[%c0_24, %c16_25] : memref<32x32xbf16, #tpu.memory_space<vmem>>, vector<32x8xbf16>
    %cst_26 = arith.constant dense<0.000000e+00> : vector<32x32xf32>
    %53 = tpu.matmul %51, %52, %cst_26 {dimension_numbers = #tpu.dot_dimension_numbers<[1], [1], [0], [0], [0, 0, 1, 0], [], []>} : vector<32x8xbf16>, vector<32x8xbf16>, vector<32x32xf32> -> vector<32x32xf32>
    %54 = vector.broadcast %8 : vector<1x32xf32> to vector<32x32xf32>
    %55 = arith.addf %53, %54 : vector<32x32xf32>
    %cst_27 = arith.constant dense<0xFF800000> : vector<32xf32>
    %56 = vector.multi_reduction <maximumf>, %55, %cst_27 [1] : vector<32x32xf32> to vector<32xf32>
    %57 = vector.shape_cast %56 : vector<32xf32> to vector<32x1xf32>
    %58 = vector.broadcast %57 : vector<32x1xf32> to vector<32x32xf32>
    %59 = arith.subf %55, %58 : vector<32x32xf32>
    %60 = math.exp %59 : vector<32x32xf32>
    %cst_28 = arith.constant dense<0.000000e+00> : vector<32xf32>
    %61 = vector.multi_reduction <add>, %60, %cst_28 [1] : vector<32x32xf32> to vector<32xf32>
    %62 = vector.shape_cast %61 : vector<32xf32> to vector<32x1xf32>
    %63 = tpu.reciprocal %62 {approx = true} : vector<32x1xf32> -> vector<32x1xf32>
    %64 = vector.broadcast %63 : vector<32x1xf32> to vector<32x32xf32>
    %65 = arith.mulf %60, %64 : vector<32x32xf32>
    %66 = arith.truncf %65 : vector<32x32xf32> to vector<32x32xbf16>
    %c0_29 = arith.constant 0 : index
    %c16_30 = arith.constant 16 : index
    %67 = vector.load %arg4[%c0_29, %c16_30] : memref<32x32xbf16, #tpu.memory_space<vmem>>, vector<32x8xbf16>
    %cst_31 = arith.constant dense<0.000000e+00> : vector<32x8xf32>
    %68 = tpu.matmul %66, %67, %cst_31 {dimension_numbers = #tpu.dot_dimension_numbers<[1], [0], [0], [1], [0, 0, 1, 1], [], []>} : vector<32x32xbf16>, vector<32x8xbf16>, vector<32x8xf32> -> vector<32x8xf32>
    %c0_32 = arith.constant 0 : index
    %c24 = arith.constant 24 : index
    %69 = vector.load %arg2[%c0_32, %c24] : memref<32x32xbf16, #tpu.memory_space<vmem>>, vector<32x8xbf16>
    %cst_33 = arith.constant 3.535160e-01 : bf16
    %70 = vector.broadcast %cst_33 : bf16 to vector<32x8xbf16>
    %71 = arith.mulf %69, %70 : vector<32x8xbf16>
    %c0_34 = arith.constant 0 : index
    %c24_35 = arith.constant 24 : index
    %72 = vector.load %arg3[%c0_34, %c24_35] : memref<32x32xbf16, #tpu.memory_space<vmem>>, vector<32x8xbf16>
    %cst_36 = arith.constant dense<0.000000e+00> : vector<32x32xf32>
    %73 = tpu.matmul %71, %72, %cst_36 {dimension_numbers = #tpu.dot_dimension_numbers<[1], [1], [0], [0], [0, 0, 1, 0], [], []>} : vector<32x8xbf16>, vector<32x8xbf16>, vector<32x32xf32> -> vector<32x32xf32>
    %74 = vector.broadcast %8 : vector<1x32xf32> to vector<32x32xf32>
    %75 = arith.addf %73, %74 : vector<32x32xf32>
    %cst_37 = arith.constant dense<0xFF800000> : vector<32xf32>
    %76 = vector.multi_reduction <maximumf>, %75, %cst_37 [1] : vector<32x32xf32> to vector<32xf32>
    %77 = vector.shape_cast %76 : vector<32xf32> to vector<32x1xf32>
    %78 = vector.broadcast %77 : vector<32x1xf32> to vector<32x32xf32>
    %79 = arith.subf %75, %78 : vector<32x32xf32>
    %80 = math.exp %79 : vector<32x32xf32>
    %cst_38 = arith.constant dense<0.000000e+00> : vector<32xf32>
    %81 = vector.multi_reduction <add>, %80, %cst_38 [1] : vector<32x32xf32> to vector<32xf32>
    %82 = vector.shape_cast %81 : vector<32xf32> to vector<32x1xf32>
    %83 = tpu.reciprocal %82 {approx = true} : vector<32x1xf32> -> vector<32x1xf32>
    %84 = vector.broadcast %83 : vector<32x1xf32> to vector<32x32xf32>
    %85 = arith.mulf %80, %84 : vector<32x32xf32>
    %86 = arith.truncf %85 : vector<32x32xf32> to vector<32x32xbf16>
    %c0_39 = arith.constant 0 : index
    %c24_40 = arith.constant 24 : index
    %87 = vector.load %arg4[%c0_39, %c24_40] : memref<32x32xbf16, #tpu.memory_space<vmem>>, vector<32x8xbf16>
    %cst_41 = arith.constant dense<0.000000e+00> : vector<32x8xf32>
    %88 = tpu.matmul %86, %87, %cst_41 {dimension_numbers = #tpu.dot_dimension_numbers<[1], [0], [0], [1], [0, 0, 1, 1], [], []>} : vector<32x32xbf16>, vector<32x8xbf16>, vector<32x8xf32> -> vector<32x8xf32>
    %89 = tpu.concatenate %28, %48, %68, %88 in 1 : vector<32x8xf32>, vector<32x8xf32>, vector<32x8xf32>, vector<32x8xf32> -> vector<32x32xf32>
    %c0_42 = arith.constant 0 : index
    %c0_43 = arith.constant 0 : index
    %90 = vector.load %arg9[%c0_42, %c0_43] : memref<32x32xf32, #tpu.memory_space<vmem>>, vector<32x32xf32>
    %91 = arith.truncf %89 : vector<32x32xf32> to vector<32x32xbf16>
    %c0_44 = arith.constant 0 : index
    %c0_45 = arith.constant 0 : index
    %92 = vector.load %arg6[%c0_44, %c0_45] : memref<32x32xbf16, #tpu.memory_space<vmem>>, vector<32x32xbf16>
    %cst_46 = arith.constant dense<0.000000e+00> : vector<32x32xf32>
    %93 = tpu.matmul %91, %92, %cst_46 {dimension_numbers = #tpu.dot_dimension_numbers<[1], [0], [0], [1], [0, 0, 1, 1], [], []>} : vector<32x32xbf16>, vector<32x32xbf16>, vector<32x32xf32> -> vector<32x32xf32>
    %94 = arith.addf %90, %93 : vector<32x32xf32>
    %c0_47 = arith.constant 0 : index
    %c0_48 = arith.constant 0 : index
    %95 = vector.load %arg9[%c0_47, %c0_48] : memref<32x32xf32, #tpu.memory_space<vmem>>, vector<32x32xf32>
    tpu.vector_store %arg9[%c0_47, %c0_48], %94 {strides = array<i32>} : memref<32x32xf32, #tpu.memory_space<vmem>>, vector<32x32xf32>,
    %c0_i32_49 = arith.constant 0 : i32
    %96 = arith.cmpi eq, %arg1, %c0_i32_49 : i32
    %97 = arith.extui %96 : i1 to i32
    %c0_i32_50 = arith.constant 0 : i32
    %98 = arith.cmpi ne, %97, %c0_i32_50 : i32
    scf.if %98 {
      %c0_51 = arith.constant 0 : index
      %c0_52 = arith.constant 0 : index
      %99 = vector.load %arg9[%c0_51, %c0_52] : memref<32x32xf32, #tpu.memory_space<vmem>>, vector<32x32xf32>
      %c0_53 = arith.constant 0 : index
      %c0_54 = arith.constant 0 : index
      %100 = vector.load %arg7[%c0_53, %c0_54] : memref<1x32xf32, #tpu.memory_space<vmem>>, vector<1x32xf32>
      %101 = vector.broadcast %100 : vector<1x32xf32> to vector<32x32xf32>
      %102 = arith.addf %99, %101 : vector<32x32xf32>
      %c0_55 = arith.constant 0 : index
      %c0_56 = arith.constant 0 : index
      %103 = vector.load %arg5[%c0_55, %c0_56] : memref<32x32xf32, #tpu.memory_space<vmem>>, vector<32x32xf32>
      %104 = arith.addf %102, %103 : vector<32x32xf32>
      %c0_57 = arith.constant 0 : index
      %c0_58 = arith.constant 0 : index
      %105 = vector.load %arg8[%c0_57, %c0_58] : memref<32x32xf32, #tpu.memory_space<vmem>>, vector<32x32xf32>
      tpu.vector_store %arg8[%c0_57, %c0_58], %104 {strides = array<i32>} : memref<32x32xf32, #tpu.memory_space<vmem>>, vector<32x32xf32>,
    } else {
    }
    return
  }
  func.func @transform_0(%arg0: i32, %arg1: i32) -> (i32, i32) {
    %c0_i32 = arith.constant 0 : i32
    return %arg0, %arg1 : i32, i32
  }
  func.func @transform_1(%arg0: i32, %arg1: i32) -> (i32, i32) {
    %c0_i32 = arith.constant 0 : i32
    return %arg0, %arg1 : i32, i32
  }
  func.func @transform_2(%arg0: i32, %arg1: i32) -> (i32, i32) {
    %c0_i32 = arith.constant 0 : i32
    return %arg0, %arg1 : i32, i32
  }
  func.func @transform_3(%arg0: i32, %arg1: i32) -> (i32, i32) {
    %c0_i32 = arith.constant 0 : i32
    %c0_i32_0 = arith.constant 0 : i32
    return %arg0, %c0_i32 : i32, i32
  }
  func.func @transform_4(%arg0: i32, %arg1: i32) -> (i32, i32) {
    %c0_i32 = arith.constant 0 : i32
    %c0_i32_0 = arith.constant 0 : i32
    return %arg1, %c0_i32 : i32, i32
  }
  func.func @transform_5(%arg0: i32, %arg1: i32) -> (i32, i32) {
    %c0_i32 = arith.constant 0 : i32
    %c0_i32_0 = arith.constant 0 : i32
    %c0_i32_1 = arith.constant 0 : i32
    return %c0_i32, %c0_i32_0 : i32, i32
  }
  func.func @transform_6(%arg0: i32, %arg1: i32) -> (i32, i32) {
    %c0_i32 = arith.constant 0 : i32
    %c0_i32_0 = arith.constant 0 : i32
    return %arg0, %c0_i32 : i32, i32
  }
}

module attributes {stable_mosaic.version = 11 : i64} {
  func.func @ln_mlp_res_kernel(%arg0: i32, %arg1: memref<64x32xf32, #tpu.memory_space<vmem>>, %arg2: memref<1x32xf32, #tpu.memory_space<vmem>>, %arg3: memref<1x32xf32, #tpu.memory_space<vmem>>, %arg4: memref<32x64xbf16, #tpu.memory_space<vmem>>, %arg5: memref<1x64xf32, #tpu.memory_space<vmem>>, %arg6: memref<64x32xbf16, #tpu.memory_space<vmem>>, %arg7: memref<1x32xf32, #tpu.memory_space<vmem>>, %arg8: memref<64x32xf32, #tpu.memory_space<vmem>>) attributes {dimension_semantics = [#tpu.dimension_semantics<parallel>], iteration_bounds = array<i64: 1>, scalar_prefetch = 0 : i64, scratch_operands = 0 : i64, tpu.core_type = #tpu.core_type<tc>, window_params = [{transform_indices = @transform_0, window_bounds = array<i64: 64, 32>}, {pipeline_mode = #tpu.pipeline_mode<synchronous>, transform_indices = @transform_1, window_bounds = array<i64: 1, 32>}, {pipeline_mode = #tpu.pipeline_mode<synchronous>, transform_indices = @transform_2, window_bounds = array<i64: 1, 32>}, {pipeline_mode = #tpu.pipeline_mode<synchronous>, transform_indices = @transform_3, window_bounds = array<i64: 32, 64>}, {pipeline_mode = #tpu.pipeline_mode<synchronous>, transform_indices = @transform_4, window_bounds = array<i64: 1, 64>}, {pipeline_mode = #tpu.pipeline_mode<synchronous>, transform_indices = @transform_5, window_bounds = array<i64: 64, 32>}, {pipeline_mode = #tpu.pipeline_mode<synchronous>, transform_indices = @transform_6, window_bounds = array<i64: 1, 32>}, {transform_indices = @transform_7, window_bounds = array<i64: 64, 32>}]} {
    %c0 = arith.constant 0 : index
    %c0_0 = arith.constant 0 : index
    %0 = vector.load %arg1[%c0, %c0_0] : memref<64x32xf32, #tpu.memory_space<vmem>>, vector<64x32xf32>
    %c0_1 = arith.constant 0 : index
    %c0_2 = arith.constant 0 : index
    %1 = vector.load %arg2[%c0_1, %c0_2] : memref<1x32xf32, #tpu.memory_space<vmem>>, vector<1x32xf32>
    %c0_3 = arith.constant 0 : index
    %c0_4 = arith.constant 0 : index
    %2 = vector.load %arg3[%c0_3, %c0_4] : memref<1x32xf32, #tpu.memory_space<vmem>>, vector<1x32xf32>
    %cst = arith.constant dense<0.000000e+00> : vector<64xf32>
    %3 = vector.multi_reduction <add>, %0, %cst [1] : vector<64x32xf32> to vector<64xf32>
    %4 = vector.shape_cast %3 : vector<64xf32> to vector<64x1xf32>
    %cst_5 = arith.constant 3.200000e+01 : f32
    %5 = vector.broadcast %cst_5 : f32 to vector<64x1xf32>
    %6 = arith.divf %4, %5 : vector<64x1xf32>
    %7 = vector.broadcast %6 : vector<64x1xf32> to vector<64x32xf32>
    %8 = arith.subf %0, %7 : vector<64x32xf32>
    %9 = arith.mulf %8, %8 : vector<64x32xf32>
    %cst_6 = arith.constant dense<0.000000e+00> : vector<64xf32>
    %10 = vector.multi_reduction <add>, %9, %cst_6 [1] : vector<64x32xf32> to vector<64xf32>
    %11 = vector.shape_cast %10 : vector<64xf32> to vector<64x1xf32>
    %cst_7 = arith.constant 3.200000e+01 : f32
    %12 = vector.broadcast %cst_7 : f32 to vector<64x1xf32>
    %13 = arith.divf %11, %12 : vector<64x1xf32>
    %14 = vector.broadcast %6 : vector<64x1xf32> to vector<64x32xf32>
    %15 = arith.subf %0, %14 : vector<64x32xf32>
    %cst_8 = arith.constant 9.99999974E-6 : f32
    %16 = vector.broadcast %cst_8 : f32 to vector<64x1xf32>
    %17 = arith.addf %13, %16 : vector<64x1xf32>
    %18 = math.rsqrt %17 : vector<64x1xf32>
    %19 = vector.broadcast %18 : vector<64x1xf32> to vector<64x32xf32>
    %20 = arith.mulf %15, %19 : vector<64x32xf32>
    %21 = vector.broadcast %1 : vector<1x32xf32> to vector<64x32xf32>
    %22 = arith.mulf %20, %21 : vector<64x32xf32>
    %23 = vector.broadcast %2 : vector<1x32xf32> to vector<64x32xf32>
    %24 = arith.addf %22, %23 : vector<64x32xf32>
    %25 = arith.truncf %24 : vector<64x32xf32> to vector<64x32xbf16>
    %c0_9 = arith.constant 0 : index
    %c0_10 = arith.constant 0 : index
    %26 = vector.load %arg4[%c0_9, %c0_10] : memref<32x64xbf16, #tpu.memory_space<vmem>>, vector<32x64xbf16>
    %cst_11 = arith.constant dense<0.000000e+00> : vector<64x64xf32>
    %27 = tpu.matmul %25, %26, %cst_11 {dimension_numbers = #tpu.dot_dimension_numbers<[1], [0], [0], [1], [0, 0, 1, 1], [], []>} : vector<64x32xbf16>, vector<32x64xbf16>, vector<64x64xf32> -> vector<64x64xf32>
    %c0_12 = arith.constant 0 : index
    %c0_13 = arith.constant 0 : index
    %28 = vector.load %arg5[%c0_12, %c0_13] : memref<1x64xf32, #tpu.memory_space<vmem>>, vector<1x64xf32>
    %29 = vector.broadcast %28 : vector<1x64xf32> to vector<64x64xf32>
    %30 = arith.addf %27, %29 : vector<64x64xf32>
    %cst_14 = arith.constant 5.000000e-01 : f32
    %31 = vector.broadcast %cst_14 : f32 to vector<64x64xf32>
    %32 = arith.mulf %31, %30 : vector<64x64xf32>
    %cst_15 = arith.constant 0.707106769 : f32
    %33 = vector.broadcast %cst_15 : f32 to vector<64x64xf32>
    %34 = arith.mulf %30, %33 : vector<64x64xf32>
    %35 = math.erf %34 : vector<64x64xf32>
    %cst_16 = arith.constant 1.000000e+00 : f32
    %36 = vector.broadcast %cst_16 : f32 to vector<64x64xf32>
    %37 = arith.addf %36, %35 : vector<64x64xf32>
    %38 = arith.mulf %32, %37 : vector<64x64xf32>
    %39 = arith.truncf %38 : vector<64x64xf32> to vector<64x64xbf16>
    %c0_17 = arith.constant 0 : index
    %c0_18 = arith.constant 0 : index
    %40 = vector.load %arg6[%c0_17, %c0_18] : memref<64x32xbf16, #tpu.memory_space<vmem>>, vector<64x32xbf16>
    %cst_19 = arith.constant dense<0.000000e+00> : vector<64x32xf32>
    %41 = tpu.matmul %39, %40, %cst_19 {dimension_numbers = #tpu.dot_dimension_numbers<[1], [0], [0], [1], [0, 0, 1, 1], [], []>} : vector<64x64xbf16>, vector<64x32xbf16>, vector<64x32xf32> -> vector<64x32xf32>
    %c0_20 = arith.constant 0 : index
    %c0_21 = arith.constant 0 : index
    %42 = vector.load %arg7[%c0_20, %c0_21] : memref<1x32xf32, #tpu.memory_space<vmem>>, vector<1x32xf32>
    %43 = vector.broadcast %42 : vector<1x32xf32> to vector<64x32xf32>
    %44 = arith.addf %41, %43 : vector<64x32xf32>
    %45 = arith.addf %0, %44 : vector<64x32xf32>
    %c0_22 = arith.constant 0 : index
    %c0_23 = arith.constant 0 : index
    %46 = vector.load %arg8[%c0_22, %c0_23] : memref<64x32xf32, #tpu.memory_space<vmem>>, vector<64x32xf32>
    tpu.vector_store %arg8[%c0_22, %c0_23], %45 {strides = array<i32>} : memref<64x32xf32, #tpu.memory_space<vmem>>, vector<64x32xf32>,
    return
  }
  func.func @transform_0(%arg0: i32) -> (i32, i32) {
    %c0_i32 = arith.constant 0 : i32
    %c0_i32_0 = arith.constant 0 : i32
    return %arg0, %c0_i32 : i32, i32
  }
  func.func @transform_1(%arg0: i32) -> (i32, i32) {
    %c0_i32 = arith.constant 0 : i32
    %c0_i32_0 = arith.constant 0 : i32
    %c0_i32_1 = arith.constant 0 : i32
    return %c0_i32, %c0_i32_0 : i32, i32
  }
  func.func @transform_2(%arg0: i32) -> (i32, i32) {
    %c0_i32 = arith.constant 0 : i32
    %c0_i32_0 = arith.constant 0 : i32
    %c0_i32_1 = arith.constant 0 : i32
    return %c0_i32, %c0_i32_0 : i32, i32
  }
  func.func @transform_3(%arg0: i32) -> (i32, i32) {
    %c0_i32 = arith.constant 0 : i32
    %c0_i32_0 = arith.constant 0 : i32
    %c0_i32_1 = arith.constant 0 : i32
    return %c0_i32, %c0_i32_0 : i32, i32
  }
  func.func @transform_4(%arg0: i32) -> (i32, i32) {
    %c0_i32 = arith.constant 0 : i32
    %c0_i32_0 = arith.constant 0 : i32
    %c0_i32_1 = arith.constant 0 : i32
    return %c0_i32, %c0_i32_0 : i32, i32
  }
  func.func @transform_5(%arg0: i32) -> (i32, i32) {
    %c0_i32 = arith.constant 0 : i32
    %c0_i32_0 = arith.constant 0 : i32
    %c0_i32_1 = arith.constant 0 : i32
    return %c0_i32, %c0_i32_0 : i32, i32
  }
  func.func @transform_6(%arg0: i32) -> (i32, i32) {
    %c0_i32 = arith.constant 0 : i32
    %c0_i32_0 = arith.constant 0 : i32
    %c0_i32_1 = arith.constant 0 : i32
    return %c0_i32, %c0_i32_0 : i32, i32
  }
  func.func @transform_7(%arg0: i32) -> (i32, i32) {
    %c0_i32 = arith.constant 0 : i32
    %c0_i32_0 = arith.constant 0 : i32
    return %arg0, %c0_i32 : i32, i32
  }
}

module attributes {stable_mosaic.version = 11 : i64} {
  func.func @head_kernel(%arg0: i32, %arg1: memref<2x32xf32, #tpu.memory_space<vmem>>, %arg2: memref<1x32xf32, #tpu.memory_space<vmem>>, %arg3: memref<1x32xf32, #tpu.memory_space<vmem>>, %arg4: memref<32x10xbf16, #tpu.memory_space<vmem>>, %arg5: memref<1x10xf32, #tpu.memory_space<vmem>>, %arg6: memref<2x10xf32, #tpu.memory_space<vmem>>) attributes {dimension_semantics = [#tpu.dimension_semantics<arbitrary>], iteration_bounds = array<i64: 1>, scalar_prefetch = 0 : i64, scratch_operands = 0 : i64, tpu.core_type = #tpu.core_type<tc>, window_params = [{pipeline_mode = #tpu.pipeline_mode<synchronous>, transform_indices = @transform_0, window_bounds = array<i64: 2, 32>}, {pipeline_mode = #tpu.pipeline_mode<synchronous>, transform_indices = @transform_1, window_bounds = array<i64: 1, 32>}, {pipeline_mode = #tpu.pipeline_mode<synchronous>, transform_indices = @transform_2, window_bounds = array<i64: 1, 32>}, {pipeline_mode = #tpu.pipeline_mode<synchronous>, transform_indices = @transform_3, window_bounds = array<i64: 32, 10>}, {pipeline_mode = #tpu.pipeline_mode<synchronous>, transform_indices = @transform_4, window_bounds = array<i64: 1, 10>}, {pipeline_mode = #tpu.pipeline_mode<synchronous>, transform_indices = @transform_5, window_bounds = array<i64: 2, 10>}]} {
    %c0 = arith.constant 0 : index
    %c0_0 = arith.constant 0 : index
    %0 = vector.load %arg1[%c0, %c0_0] : memref<2x32xf32, #tpu.memory_space<vmem>>, vector<2x32xf32>
    %c0_1 = arith.constant 0 : index
    %c0_2 = arith.constant 0 : index
    %1 = vector.load %arg2[%c0_1, %c0_2] : memref<1x32xf32, #tpu.memory_space<vmem>>, vector<1x32xf32>
    %c0_3 = arith.constant 0 : index
    %c0_4 = arith.constant 0 : index
    %2 = vector.load %arg3[%c0_3, %c0_4] : memref<1x32xf32, #tpu.memory_space<vmem>>, vector<1x32xf32>
    %cst = arith.constant dense<0.000000e+00> : vector<2xf32>
    %3 = vector.multi_reduction <add>, %0, %cst [1] : vector<2x32xf32> to vector<2xf32>
    %4 = vector.shape_cast %3 : vector<2xf32> to vector<2x1xf32>
    %cst_5 = arith.constant 3.200000e+01 : f32
    %5 = vector.broadcast %cst_5 : f32 to vector<2x1xf32>
    %6 = arith.divf %4, %5 : vector<2x1xf32>
    %7 = vector.broadcast %6 : vector<2x1xf32> to vector<2x32xf32>
    %8 = arith.subf %0, %7 : vector<2x32xf32>
    %9 = arith.mulf %8, %8 : vector<2x32xf32>
    %cst_6 = arith.constant dense<0.000000e+00> : vector<2xf32>
    %10 = vector.multi_reduction <add>, %9, %cst_6 [1] : vector<2x32xf32> to vector<2xf32>
    %11 = vector.shape_cast %10 : vector<2xf32> to vector<2x1xf32>
    %cst_7 = arith.constant 3.200000e+01 : f32
    %12 = vector.broadcast %cst_7 : f32 to vector<2x1xf32>
    %13 = arith.divf %11, %12 : vector<2x1xf32>
    %14 = vector.broadcast %6 : vector<2x1xf32> to vector<2x32xf32>
    %15 = arith.subf %0, %14 : vector<2x32xf32>
    %cst_8 = arith.constant 9.99999974E-6 : f32
    %16 = vector.broadcast %cst_8 : f32 to vector<2x1xf32>
    %17 = arith.addf %13, %16 : vector<2x1xf32>
    %18 = math.rsqrt %17 : vector<2x1xf32>
    %19 = vector.broadcast %18 : vector<2x1xf32> to vector<2x32xf32>
    %20 = arith.mulf %15, %19 : vector<2x32xf32>
    %21 = vector.broadcast %1 : vector<1x32xf32> to vector<2x32xf32>
    %22 = arith.mulf %20, %21 : vector<2x32xf32>
    %23 = vector.broadcast %2 : vector<1x32xf32> to vector<2x32xf32>
    %24 = arith.addf %22, %23 : vector<2x32xf32>
    %25 = arith.truncf %24 : vector<2x32xf32> to vector<2x32xbf16>
    %c0_9 = arith.constant 0 : index
    %c0_10 = arith.constant 0 : index
    %26 = vector.load %arg4[%c0_9, %c0_10] : memref<32x10xbf16, #tpu.memory_space<vmem>>, vector<32x10xbf16>
    %cst_11 = arith.constant dense<0.000000e+00> : vector<2x10xf32>
    %27 = tpu.matmul %25, %26, %cst_11 {dimension_numbers = #tpu.dot_dimension_numbers<[1], [0], [0], [1], [0, 0, 1, 1], [], []>} : vector<2x32xbf16>, vector<32x10xbf16>, vector<2x10xf32> -> vector<2x10xf32>
    %c0_12 = arith.constant 0 : index
    %c0_13 = arith.constant 0 : index
    %28 = vector.load %arg5[%c0_12, %c0_13] : memref<1x10xf32, #tpu.memory_space<vmem>>, vector<1x10xf32>
    %29 = vector.broadcast %28 : vector<1x10xf32> to vector<2x10xf32>
    %30 = arith.addf %27, %29 : vector<2x10xf32>
    %c0_14 = arith.constant 0 : index
    %c0_15 = arith.constant 0 : index
    %31 = vector.load %arg6[%c0_14, %c0_15] : memref<2x10xf32, #tpu.memory_space<vmem>>, vector<2x10xf32>
    tpu.vector_store %arg6[%c0_14, %c0_15], %30 {strides = array<i32>} : memref<2x10xf32, #tpu.memory_space<vmem>>, vector<2x10xf32>,
    return
  }
  func.func @transform_0(%arg0: i32) -> (i32, i32) {
    %c0_i32 = arith.constant 0 : i32
    %c0_i32_0 = arith.constant 0 : i32
    %c0_i32_1 = arith.constant 0 : i32
    return %c0_i32, %c0_i32_0 : i32, i32
  }
  func.func @transform_1(%arg0: i32) -> (i32, i32) {
    %c0_i32 = arith.constant 0 : i32
    %c0_i32_0 = arith.constant 0 : i32
    %c0_i32_1 = arith.constant 0 : i32
    return %c0_i32, %c0_i32_0 : i32, i32
  }
  func.func @transform_2(%arg0: i32) -> (i32, i32) {
    %c0_i32 = arith.constant 0 : i32
    %c0_i32_0 = arith.constant 0 : i32
    %c0_i32_1 = arith.constant 0 : i32
    return %c0_i32, %c0_i32_0 : i32, i32
  }
  func.func @transform_3(%arg0: i32) -> (i32, i32) {
    %c0_i32 = arith.constant 0 : i32
    %c0_i32_0 = arith.constant 0 : i32
    %c0_i32_1 = arith.constant 0 : i32
    return %c0_i32, %c0_i32_0 : i32, i32
  }
  func.func @transform_4(%arg0: i32) -> (i32, i32) {
    %c0_i32 = arith.constant 0 : i32
    %c0_i32_0 = arith.constant 0 : i32
    %c0_i32_1 = arith.constant 0 : i32
    return %c0_i32, %c0_i32_0 : i32, i32
  }
  func.func @transform_5(%arg0: i32) -> (i32, i32) {
    %c0_i32 = arith.constant 0 : i32
    %c0_i32_0 = arith.constant 0 : i32
    %c0_i32_1 = arith.constant 0 : i32
    return %c0_i32, %c0_i32_0 : i32, i32
  }
}

</mosaic_0001>

<bundles_post_ra>
// kernel: tpu_custom_call.1
= control target key start
LH: loop header
LB: loop body
LE: loop exit
PB: predicated region body
PF: predicated region fallthrough
CT: control target
= control target key end

     0   :  { %7 = vsyncpa [#allocation3], 0  ;;  %s690_s0 = inlined_call_operand.hbm [shape: f32[16,128], index: 0, kind: input, shape index: {}]   ;;  %s691_s1 = inlined_call_operand.hbm [shape: f32[8,128], index: 1, kind: input, shape index: {}]   ;;  %s692_s2 = inlined_call_operand.hbm [shape: f32[16,128], index: 2, kind: output, shape index: {}]  }
   0x1   :  { %9 = vsyncpa [#allocation3 + $0x1], 0 }
   0x2   :  { %10 = vsyncpa [#allocation6], 0 }
   0x3   :  { %11 = vsyncpa [#allocation4], 0 }
   0x4   :  { %13 = vsyncpa [#allocation4 + $0x1], 0  ;;  %s489_s9 = smov 0   ;;  %s491_s10 = smov 0  }
   0x5   :  { %s493_s11 = smov 0   ;;  %s495_s12 = smov 0  }
   0x6 LB: > { %s510_s13 = sadd.s32 4294967295, %s469_s12   ;;  %s270_s14 = sadd.s32 4294967294, %s469_s12   ;;  %s469_s12 = sphi %s495_s12, %s716_s12   ;;  %s465_s11 = sphi %s493_s11, %s715_s11   ;;  %s461_s10 = sphi %s491_s10, %s714_s10   ;;  %s457_s9 = sphi %s489_s9, %s713_s9  }
   0x7   : > { %p39_p0 = scmp.ne.s32.totalorder %s461_s10, %s457_s9  ;;  %p693_p1 = scmp.eq.s32.totalorder %s510_s13, 0 }
   0x8   : > { %p90_p3 = scmp.eq.s32.totalorder %s270_s14, 1  ;;  %p271_p5 = scmp.ge.s32.totalorder %s469_s12, 1 }
   0x9   : > { %p519_p4 = por %p693_p1, %p39_p0  ;;  %p97_p7 = scmp.lt.s32.totalorder %s469_s12, 3 }
   0xa   : > { %p524_p6 = por %p90_p3, %p39_p0  ;;  %s471_s18 = smov [#allocation5]  }
   0xb   : > { %s696_s15 = scalar_select %p519_p4, 1, 0 }
   0xc   : > { %s697_s16 = scalar_select %p524_p6, 1, 0 }
   0xd   : > { %p529_p8 = pnand %p271_p5, %p97_p7  ;;  %s110_s19 = sshll.u32 %s471_s18, 4  ;;  %s111_s19 = int_to_ptr.vmem [resolvable:$true] %s110_s19 }
   0xe   : > { %s537_s20 = sadd.s32 1, %s469_s12   ;;  %s26_s24 = sadd.s32 1, %s465_s11 }
   0xf   : > { %s698_s17 = scalar_select %p529_p8, 1, 0 }
  0x10   : > { %p292_p10 = pneg %p529_p8  ;;  %s23_s22 = ssub.s32 %s469_s12, %s537_s20 }
  0x11   : > { %p547_p12 = scmp.eq.s32.totalorder %s23_s22, 0  ;;  %s341_s27 = scalar_lea.hbm %s691_s1, 128 }
  0x12   : > { %p541_p11 = pnand %p292_p10, %p693_p1  ;;  %p342_p0 = scmp.ne.s32.totalorder %s691_s1, %s341_s27 }
  0x13   : > { %s700_s23 = scalar_select %p547_p12, 1, 0 }
  0x14   : > { %p343_p3 = pneg %p541_p11  ;;  %p348_p10 = scmp.lt.u32.totalorder %s341_s27, %s691_s1 }
  0x16   : > { %p344_p5 = pnand %p343_p3, %p342_p0 }
  0x18   : > { %p345_p7 = pneg %p344_p5 }
  0x1a   : > { %p350_p9 = pnand %p348_p10, %p345_p7 }
  0x1c   : > { %353 = shalt.err (!%p350_p9)
}
  0x1d   : > { %s354_s4 = scalar_lea.vmem %s111_s19, 128  ;;  %p362_p6 = scmp.lt.s32.totalorder %s111_s19, %s111_s19 }
  0x1e   : > { %p355_p1 = scmp.ne.s32.totalorder %s111_s19, %s354_s4  ;;  %p363_p4 = scmp.lt.s32.totalorder %s354_s4, %s354_s4 }
  0x20   : > { %p357_p2 = pnand %p355_p1, %p343_p3  ;;  %p364_p8 = por %p363_p4, %p362_p6 }
  0x22   : > { %p358_p13 = pneg %p357_p2 }
  0x24   : > { %p365_p12 = pnand %p364_p8, %p358_p13 }
  0x26   : > { %368 = shalt.err (!%p365_p12)
}
  0x27   : > { %295 = dma.hbm_to_vmem [thread:$0]  (!%p541_p11), %s691_s1, 128, %s111_s19, [#allocation6]  }
  0x28   : > { %p701_p1 = scmp.ne.s32.totalorder %s700_s23, 0  ;;  %p34_p2 = scmp.eq.s32.totalorder %s469_s12, 0 }
  0x29   : > { %p702_p4 = scmp.ne.s32.totalorder %s465_s11, %s461_s10  ;;  %p703_p6 = scmp.eq.s32.totalorder %s510_s13, 1 }
  0x2a   : > { %s573_s7 = scalar_select %p701_p1, %s465_s11, %s26_s24  }
  0x2b   : > { %p581_p8 = por %p703_p6, %p702_p4  ;;  %p305_p9 = scmp.lt.s32.totalorder %s469_s12, 2 }
  0x2c   : > { %s121_s14 = sand.u32 1, %s465_s11   ;;  %p705_p12 = pmov %p702_p4 }
  0x2d   : > { %s274_s18 = sshll.u32 %s121_s14, 3  ;;  %s275_s21 = sshll.u32 %s469_s12, 7 }
  0x2e   : > { %p35_p13 = por %p34_p2, %p705_p12  ;;  %s594_s19 = scalar_lea.hbm %s690_s0, %s275_s21 }
  0x2f   : > { %s125_s23 = scalar_lea.vmem [#allocation2], %s274_s18  ;;  %s122_s27 = scalar_lea.sflag [#allocation3], %s121_s14 }
  0x30   : > { %s132_s24 = sshll.u32 %s125_s23, 4  ;;  %p596_p11 = pnand %p305_p9, %p35_p13  ;;  %s600_s24 = int_to_ptr.vmem [resolvable:$true] %s132_s24 }
  0x31   : > { %s369_s28 = scalar_lea.hbm %s594_s19, 128  ;;  %s374_s3 = scalar_lea.hbm %s690_s0, 256 }
  0x32   : > { %p370_p0 = scmp.ne.s32.totalorder %s594_s19, %s369_s28  ;;  %p371_p3 = pneg %p596_p11 }
  0x33   : > { %p375_p10 = scmp.lt.u32.totalorder %s594_s19, %s690_s0  ;;  %p376_p1 = scmp.lt.u32.totalorder %s374_s3, %s369_s28 }
  0x34   : > { %p372_p5 = pnand %p371_p3, %p370_p0  ;;  %p378_p4 = scmp.lt.u32.totalorder %s369_s28, %s594_s19 }
  0x35   : > { %p377_p2 = por %p376_p1, %p375_p10 }
  0x36   : > { %p373_p7 = pneg %p372_p5 }
  0x37   : > { %p379_p6 = por %p378_p4, %p377_p2 }
  0x39   : > { %p380_p9 = pnand %p379_p6, %p373_p7 }
  0x3b   : > { %383 = shalt.err (!%p380_p9)
}
  0x3c   : > { %s384_s6 = scalar_lea.vmem %s600_s24, 128  ;;  %s472_s14 = smov [#allocation2]  }
  0x3d   : > { %p385_p12 = scmp.ne.s32.totalorder %s600_s24, %s384_s6  ;;  %s389_s18 = sshll.u32 %s472_s14, 4  ;;  %s390_s18 = int_to_ptr.vmem [resolvable:$false] %s389_s18 }
  0x3e   : > { %s391_s21 = scalar_lea.vmem %s390_s18, 256  ;;  %p392_p5 = scmp.lt.s32.totalorder %s600_s24, %s390_s18 }
  0x3f   : > { %p387_p13 = pnand %p385_p12, %p371_p3  ;;  %p393_p10 = scmp.lt.s32.totalorder %s391_s21, %s384_s6 }
  0x41   : > { %p388_p0 = pneg %p387_p13  ;;  %p394_p1 = por %p393_p10, %p392_p5 }
  0x43   : > { %p395_p2 = pnand %p394_p1, %p388_p0 }
  0x45   : > { %398 = shalt.err (!%p395_p2)
}
  0x46   : > { %299 = dma.hbm_to_vmem [thread:$0]  (!%p596_p11), %s594_s19, 128, %s600_s24, %s122_s27  }
  0x47   : > { %p707_p7 = scmp.ne.s32.totalorder %s698_s17, 0 }
  0x48   : > { %s630_s22 = sand.u32 (!%p707_p7), 1, %s461_s10   ;;  %p708_p3 = scmp.ne.s32.totalorder (!%p707_p7), %s696_s15, 0 }
  0x49   : > { %141 = sbr.rel (%p707_p7) target bundleno = 109 (0x6d), region = 28  ;;  %s277_s25 = sshll.u32 (!%p707_p7), %s630_s22, 3 }
  0x4a   : > { %s144_s23 = scalar_lea.sflag (!%p707_p7), [#allocation3], %s630_s22  ;;  %s147_s28 = scalar_lea.vmem (!%p707_p7), [#allocation2], %s277_s25 }
  0x50   : > { %444 = dma.done.wait (%p708_p3), %s144_s23, 128  }
  0x51   : > { %446 = vsyncadd (%p708_p3), %s144_s23, 4294967168  ;;  %p709_p4 = scmp.eq.s32.totalorder %s510_s13, 0 }
  0x53   : > { %448 = dma.done.wait (%p709_p4), [#allocation6], 128   ;;  %p710_p11 = pmov %p709_p4 }
  0x54   : > { %s171_s17 = scalar_lea.vmem [#allocation7], %s277_s25  ;;  %s281_s24 = sshll.u32 %s510_s13, 7  ;;  %v172_v0 = vld [vmem:[%s147_s28] sm:$0xff]  ;;  %v173_v1 = vld [vmem:[#allocation5] sm:$0xff] }
  0x55   : > { %450 = vsyncadd (%p710_p11), [#allocation6], 4294967168  ;;  %s190_s19 = sshll.u32 %s171_s17, 4  ;;  %v174_v2 = vadd.f32 %v173_v1, %v172_v0  ;;  %s648_s27 = scalar_lea.hbm %s692_s2, %s281_s24  ;;  %s643_s19 = int_to_ptr.vmem [resolvable:$true] %s190_s19 }
  0x56   : > { %s177_s29 = scalar_lea.sflag [#allocation4], %s630_s22  ;;  %s399_s30 = scalar_lea.vmem %s643_s19, 128 }
  0x57   : > { %175 = vst [vmem:[%s171_s17] sm:$0xff] %v174_v2  ;;  %p400_p6 = scmp.ne.s32.totalorder %s643_s19, %s399_s30  ;;  %s473_s13 = smov [#allocation7]  }
  0x58   : > { %s403_s3 = sshll.u32 %s473_s13, 4  ;;  %s404_s3 = int_to_ptr.vmem [resolvable:$false] %s403_s3 }
  0x59   : > { %p401_p9 = pnand %p400_p6, %p581_p8  ;;  %s405_s4 = scalar_lea.vmem %s404_s3, 256 }
  0x5a   : > { %p406_p13 = scmp.lt.s32.totalorder %s643_s19, %s404_s3  ;;  %p407_p0 = scmp.lt.s32.totalorder %s405_s4, %s399_s30 }
  0x5b   : > { %p402_p12 = pneg %p401_p9 }
  0x5c   : > { %p408_p5 = por %p407_p0, %p406_p13 }
  0x5e   : > { %p409_p10 = pnand %p408_p5, %p402_p12 }
  0x60   : > { %412 = shalt.err (!%p409_p10)
}
  0x61   : > { %s413_s5 = scalar_lea.hbm %s648_s27, 128  ;;  %s417_s18 = scalar_lea.hbm %s692_s2, 256 }
  0x62   : > { %p414_p1 = scmp.ne.s32.totalorder %s648_s27, %s413_s5  ;;  %p418_p3 = scmp.lt.u32.totalorder %s648_s27, %s692_s2 }
  0x63   : > { %p419_p4 = scmp.lt.u32.totalorder %s417_s18, %s413_s5  ;;  %p421_p6 = scmp.lt.u32.totalorder %s413_s5, %s648_s27 }
  0x64   : > { %p415_p2 = pnand %p414_p1, %p581_p8 }
  0x65   : > { %p420_p11 = por %p419_p4, %p418_p3 }
  0x66   : > { %p416_p7 = pneg %p415_p2 }
  0x67   : > { %p422_p9 = por %p421_p6, %p420_p11 }
  0x69   : > { %p423_p12 = pnand %p422_p9, %p416_p7 }
  0x6b   : > { %426 = shalt.err (!%p423_p12)
}
  0x6c   : > { %290 = dma.vmem_to_hbm [thread:$0]  (%p581_p8), %s643_s19, 128, %s648_s27, %s177_s29  }
  0x6d PF: > { %s202_s25 = sand.u32 1, %s457_s9   ;;  %p711_p13 = scmp.ne.s32.totalorder %s697_s16, 0 }
  0x6e   : > { %p712_p0 = scmp.ge.s32.totalorder %s469_s12, 2  ;;  %s203_s23 = scalar_lea.sflag [#allocation4], %s202_s25 }
  0x70   : > { %p301_p5 = pnand %p712_p0, %p711_p13 }
  0x72   : > { %452 = dma.done.wait (!%p301_p5), %s203_s23, 128  }
  0x73   : > { %454 = vsyncadd (!%p301_p5), %s203_s23, 4294967168  ;;  %p16_p10 = scmp.ge.s32.totalorder %s537_s20, 4   ;;  %s713_s9 = smov %s461_s10 }
  0x74   : > { %s714_s10 = smov %s465_s11  ;;  %s715_s11 = smov %s573_s7 }
  0x75   : > { %s716_s12 = smov %s537_s20  ;;  %18 = sbr.rel (!%p16_p10) target bundleno = 6 (0x6), region = 77 }
  0x7c   :  { %208 = vsyncpa [#allocation3], 1 }
  0x7d   :  { %210 = vsyncpa [#allocation3 + $0x1], 1 }
  0x7e   :  { %211 = vsyncpa [#allocation6], 1 }
  0x7f   :  { %212 = vsyncpa [#allocation4], 1 }
  0x80   :  { %214 = vsyncpa [#allocation4 + $0x1], 1 }

// kernel: vit_forward.8
= control target key start
LH: loop header
LB: loop body
LE: loop exit
PB: predicated region body
PF: predicated region fallthrough
CT: control target
= control target key end

     0   :  { %vm52_vm0 = vcmask 392192   ;;  %vm108_vm1 = vcmask 261120   ;;  %s197_s1 = inlined_call_operand.vmem [shape: bf16[48,32], index: 1, kind: input, shape index: {}]   ;;  %s198_s0 = inlined_call_operand.vmem [shape: f32[32,48], index: 0, kind: input, shape index: {}]   ;;  %s199_s2 = inlined_call_operand.vmem [shape: f32[1,32], index: 2, kind: input, shape index: {}]   ;;  %s200_s3 = inlined_call_operand.vmem [shape: f32[32,32], index: 3, kind: output, shape index: {}]  }
   0x1   :  { %v138_v0 = vld [vmem:[%s197_s1] sm:$0xff]   ;;  %v139_v1 = vld [vmem:[%s197_s1 + $0x8] sm:$0xff]   ;;  %v140_v4 = vld [vmem:[%s197_s1 + $0x10] sm:$0xff]  }
   0x2   :  { %128 = vmatprep.subr.bf16.mxu0 %v138_v0  ;;  %v15_v2 = vld [vmem:[%s198_s0] sm:$0xff]  ;;  %v16_v3 = vld [vmem:[%s198_s0 + $0x8] sm:$0xff]  ;;  %v17_v6 = vld [vmem:[%s198_s0 + $0x10] sm:$0xff] }
   0x3   :  { %129 = vmatpush3.bf16.msra.mxu0 %v138_v0  ;;  %v19_v5 = vpack.c.bf16 %v16_v3, %v15_v2  ;;  %v18_v7 = vld [vmem:[%s198_s0 + $0x18] sm:$0xff]  ;;  %v117_v9 = vld [vmem:[%s199_s2] ss:$0 sm:$0xff] }
   0x4   :  { %130 = vmatprep.subr.bf16.mxu0 %v139_v1  ;;  %v20_v8 = vpack.c.bf16 %v18_v7, %v17_v6 }
   0x5   :  { %134 = vmatprep.mubr.msk.bf16.mxu0 %vm52_vm0, %v19_v5 }
   0x7   :  { %131 = vmatpush3.bf16.msra.mxu0 %v139_v1 }
   0x8   :  { %132 = vmatprep.subr.bf16.mxu0 %v140_v4 }
   0xb   :  { %133 = vmatpush3.bf16.msra.mxu0 %v140_v4 }
   0xe   :  { %135 = vmatmul.mubr.msk.bf16.vlgmr.msra.gmra.mrb[0].mxu0 %vm52_vm0, %v20_v8 }
  0xe1   :  { %v136_v10 = vpop.f32.mrb[0].mxu0 }
  0xe2   :  { %v102_v11 = vadd.f32 %v136_v10, %v117_v9  ;;  %v93_v12 = vpop.f32.mrb[1].mxu0 }
  0xe3   :  { %v94_v13 = vadd.f32 %v117_v9, %v93_v12  ;;  %v137_v14 = vpop.f32.mrb[2].mxu0 }
  0xe4   :  { %111 = vst.msk [vmem:[%s200_s3 + $0x10] sm:$0xff] %vm108_vm1, %v102_v11  ;;  %v105_v15 = vadd.f32 %v137_v14, %v117_v9  ;;  %v96_v16 = vpop.f32.mrb[3].mxu0 }
  0xe5   :  { %109 = vst.msk [vmem:[%s200_s3] sm:$0xff] %vm108_vm1, %v94_v13  ;;  %v97_v17 = vadd.f32 %v117_v9, %v96_v16 }
  0xe6   :  { %112 = vst.msk [vmem:[%s200_s3 + $0x18] sm:$0xff] %vm108_vm1, %v105_v15 }
  0xe7   :  { %110 = vst.msk [vmem:[%s200_s3 + $0x8] sm:$0xff] %vm108_vm1, %v97_v17 }

// kernel: vit_forward.9
= control target key start
LH: loop header
LB: loop body
LE: loop exit
PB: predicated region body
PF: predicated region fallthrough
CT: control target
= control target key end

     0   :  { %vm34_vm0 = vcmask 261120   ;;  %vm304_vm1 = vcmask 257024   ;;  %s457_s16 = smov 64   ;;  %s693_s0 = inlined_call_operand.vmem [shape: f32[64,32], index: 0, kind: input, shape index: {}]   ;;  %s694_s3 = inlined_call_operand.vmem [shape: bf16[32,96], index: 3, kind: input, shape index: {}]   ;;  %s695_s1 = inlined_call_operand.vmem [shape: f32[1,32], index: 1, kind: input, shape index: {}]   ;;  %s696_s2 = inlined_call_operand.vmem [shape: f32[1,32], index: 2, kind: input, shape index: {}]   ;;  %s697_s4 = inlined_call_operand.vmem [shape: f32[1,96], index: 4, kind: input, shape index: {}]   ;;  %s698_s5 = inlined_call_operand.vmem [shape: bf16[64,32], index: 5, kind: output, shape index: {0}]   ;;  %s699_s6 = inlined_call_operand.vmem [shape: bf16[64,32], index: 6, kind: output, shape index: {1}]   ;;  %s700_s7 = inlined_call_operand.vmem [shape: bf16[64,32], index: 7, kind: output, shape index: {2}]  }
   0x1   :  { %v24_v0 = vld [vmem:[%s693_s0] sm:$0xff]  ;;  %v25_v2 = vld [vmem:[%s693_s0 + $0x8] sm:$0xff]  ;;  %v26_v8 = vld [vmem:[%s693_s0 + $0x10] sm:$0xff] }
   0x2   :  { %v28_v1 = vld [vmem:[%s693_s0 + $0x20] sm:$0xff]  ;;  %v35_v3 = vsel %vm34_vm0, %v24_v0, 0.0  ;;  %v29_v5 = vld [vmem:[%s693_s0 + $0x28] sm:$0xff]  ;;  %v38_v6 = vsel %vm34_vm0, %v25_v2, 0.0  ;;  %v27_v9 = vld [vmem:[%s693_s0 + $0x18] sm:$0xff]  ;;  %v41_v10 = vsel %vm34_vm0, %v26_v8, 0.0 }
   0x3   :  { %v47_v4 = vsel %vm34_vm0, %v28_v1, 0.0  ;;  %36 = vadd.xlane.f32.xlu0 %v35_v3  ;;  %v50_v7 = vsel %vm34_vm0, %v29_v5, 0.0  ;;  %v44_v11 = vsel %vm34_vm0, %v27_v9, 0.0  ;;  %v30_v12 = vld [vmem:[%s693_s0 + $0x30] sm:$0xff]  ;;  %v31_v13 = vld [vmem:[%s693_s0 + $0x38] sm:$0xff]  ;;  %v438_v56 = vld [vmem:[%s694_s3] sm:$0xff]  }
   0x4   :  { %48 = vadd.xlane.f32.xlu1 %v47_v4  ;;  %v53_v14 = vsel %vm34_vm0, %v30_v12, 0.0  ;;  %v56_v15 = vsel %vm34_vm0, %v31_v13, 0.0  ;;  %420 = vmatprep.subr.bf16.mxu0 %v438_v56  ;;  %v439_v57 = vld [vmem:[%s694_s3 + $0x8] sm:$0xff]  }
   0x5   :  { %432 = vmatprep.subr.bf16.mxu1 %v438_v56  ;;  %421 = vmatpush3.bf16.msra.mxu0 %v438_v56 }
   0x6   :  { %434 = vmatpush3.bf16.msra.mxu1 %v438_v56  ;;  %422 = vmatprep.subr.bf16.mxu0 %v439_v57 }
   0x7   :  { %39 = vadd.xlane.f32.xlu0 %v38_v6  ;;  %433 = vmatprep.subr.bf16.mxu1 %v439_v57 }
   0x8   :  { %51 = vadd.xlane.f32.xlu1 %v50_v7 }
   0x9   :  { %423 = vmatpush3.bf16.msra.mxu0 %v439_v57 }
   0xa   :  { %435 = vmatpush3.bf16.msra.mxu1 %v439_v57 }
   0xb   :  { %42 = vadd.xlane.f32.xlu0 %v41_v10 }
   0xc   :  { %45 = vadd.xlane.f32.xlu1 %v44_v11 }
   0xf   :  { %54 = vadd.xlane.f32.xlu0 %v53_v14 }
  0x10   :  { %57 = vadd.xlane.f32.xlu1 %v56_v15 }
  0x90   :  { %v37_v16 = vpop.xlane.xlu0 %36 }
  0x91   :  { %v49_v17 = vpop.xlane.xlu1 %48  ;;  %v60_v18 = vmul.f32 0.03125, %v37_v16 }
  0x92   :  { %v64_v19 = vmul.f32 0.03125, %v49_v17 }
  0x93   :  { %v530_v20 = vsub.f32 %v24_v0, %v60_v18 }
  0x94   :  { %v532_v21 = vsub.f32 %v28_v1, %v64_v19  ;;  %v40_v22 = vpop.xlane.xlu0 %39  ;;  %v389_v19 = vld [vmem:[%s695_s1] ss:$0 sm:$0xff] }
  0x95   :  { %v52_v23 = vpop.xlane.xlu1 %51  ;;  %v61_v24 = vmul.f32 0.03125, %v40_v22  ;;  %v76_v26 = vmul.f32 %v530_v20, %v530_v20 }
  0x96   :  { %v65_v25 = vmul.f32 0.03125, %v52_v23  ;;  %v80_v27 = vmul.f32 %v532_v21, %v532_v21 }
  0x97   :  { %v538_v28 = vsub.f32 %v25_v2, %v61_v24  ;;  %v84_v30 = vsel %vm34_vm0, %v76_v26, 0.0 }
  0x98   :  { %v540_v29 = vsub.f32 %v29_v5, %v65_v25  ;;  %85 = vadd.xlane.f32.xlu0 %v84_v30  ;;  %v43_v31 = vpop.xlane.xlu0 %42  ;;  %v96_v33 = vsel %vm34_vm0, %v80_v27, 0.0  ;;  %v390_v27 = vld [vmem:[%s696_s2] ss:$0 sm:$0xff] }
  0x99   :  { %v46_v32 = vpop.xlane.xlu1 %45  ;;  %v62_v34 = vmul.f32 0.03125, %v43_v31  ;;  %v77_v36 = vmul.f32 %v538_v28, %v538_v28 }
  0x9a   :  { %v63_v35 = vmul.f32 0.03125, %v46_v32  ;;  %v81_v37 = vmul.f32 %v540_v29, %v540_v29 }
  0x9b   :  { %v548_v38 = vsub.f32 %v26_v8, %v62_v34  ;;  %v87_v40 = vsel %vm34_vm0, %v77_v36, 0.0 }
  0x9c   :  { %v550_v39 = vsub.f32 %v27_v9, %v63_v35  ;;  %97 = vadd.xlane.f32.xlu0 %v96_v33  ;;  %88 = vadd.xlane.f32.xlu1 %v87_v40  ;;  %v55_v41 = vpop.xlane.xlu0 %54  ;;  %v99_v43 = vsel %vm34_vm0, %v81_v37, 0.0 }
  0x9d   :  { %v58_v42 = vpop.xlane.xlu1 %57  ;;  %v66_v44 = vmul.f32 0.03125, %v55_v41  ;;  %v78_v46 = vmul.f32 %v548_v38, %v548_v38 }
  0x9e   :  { %v67_v45 = vmul.f32 0.03125, %v58_v42  ;;  %v79_v47 = vmul.f32 %v550_v39, %v550_v39 }
  0x9f   :  { %v558_v48 = vsub.f32 %v30_v12, %v66_v44  ;;  %v90_v50 = vsel %vm34_vm0, %v78_v46, 0.0 }
  0xa0   :  { %v560_v49 = vsub.f32 %v31_v13, %v67_v45  ;;  %100 = vadd.xlane.f32.xlu1 %v99_v43  ;;  %91 = vadd.xlane.f32.xlu0 %v90_v50  ;;  %v93_v51 = vsel %vm34_vm0, %v79_v47, 0.0 }
  0xa1   :  { %v82_v52 = vmul.f32 %v558_v48, %v558_v48 }
  0xa2   :  { %v83_v53 = vmul.f32 %v560_v49, %v560_v49 }
  0xa3   :  { %v102_v54 = vsel %vm34_vm0, %v82_v52, 0.0 }
  0xa4   :  { %94 = vadd.xlane.f32.xlu1 %v93_v51  ;;  %103 = vadd.xlane.f32.xlu0 %v102_v54  ;;  %v105_v55 = vsel %vm34_vm0, %v83_v53, 0.0 }
  0xa8   :  { %106 = vadd.xlane.f32.xlu1 %v105_v55 }
 0x125   :  { %v86_v58 = vpop.xlane.xlu0 %85 }
 0x126   :  { %v108_v59 = vmul.f32 0.03125, %v86_v58 }
 0x128   :  { %v116_v60 = vadd.f32 1e-05, %v108_v59 }
 0x129   :  { %v89_v61 = vpop.xlane.xlu1 %88  ;;  %v98_v62 = vpop.xlane.xlu0 %97 }
 0x12a   :  { %440 = vrsqrt.f32 %v116_v60  ;;  %v109_v63 = vmul.f32 0.03125, %v89_v61  ;;  %v112_v0 = vmul.f32 0.03125, %v98_v62 }
 0x12c   :  { %v117_v1 = vadd.f32 1e-05, %v109_v63  ;;  %v120_v2 = vadd.f32 1e-05, %v112_v0 }
 0x12d   :  { %v101_v3 = vpop.xlane.xlu1 %100  ;;  %v92_v4 = vpop.xlane.xlu0 %91 }
 0x12e   :  { %442 = vrsqrt.f32 %v117_v1  ;;  %v113_v5 = vmul.f32 0.03125, %v101_v3  ;;  %v110_v6 = vmul.f32 0.03125, %v92_v4 }
 0x12f   :  { %444 = vrsqrt.f32 %v120_v2 }
 0x130   :  { %v121_v7 = vadd.f32 1e-05, %v113_v5  ;;  %v118_v8 = vadd.f32 1e-05, %v110_v6 }
 0x131   :  { %v95_v9 = vpop.xlane.xlu1 %94  ;;  %v104_v10 = vpop.xlane.xlu0 %103 }
 0x132   :  { %446 = vrsqrt.f32 %v121_v7  ;;  %v111_v11 = vmul.f32 0.03125, %v95_v9  ;;  %v114_v12 = vmul.f32 0.03125, %v104_v10 }
 0x133   :  { %448 = vrsqrt.f32 %v118_v8 }
 0x134   :  { %v441_v13 = vpop.eup %440  ;;  %v119_v14 = vadd.f32 1e-05, %v111_v11  ;;  %v122_v15 = vadd.f32 1e-05, %v114_v12 }
 0x135   :  { %v107_v16 = vpop.xlane.xlu1 %106  ;;  %v132_v17 = vmul.f32 %v441_v13, %v530_v20 }
 0x136   :  { %450 = vrsqrt.f32 %v119_v14  ;;  %v115_v18 = vmul.f32 0.03125, %v107_v16 }
 0x137   :  { %452 = vrsqrt.f32 %v122_v15  ;;  %v146_v26 = vmul.f32 %v389_v19, %v132_v17 }
 0x138   :  { %v443_v22 = vpop.eup %442  ;;  %v123_v23 = vadd.f32 1e-05, %v115_v18 }
 0x139   :  { %v445_v24 = vpop.eup %444  ;;  %v133_v25 = vmul.f32 %v443_v22, %v538_v28  ;;  %v160_v33 = vadd.f32 %v390_v27, %v146_v26 }
 0x13a   :  { %454 = vrsqrt.f32 %v123_v23  ;;  %v136_v20 = vmul.f32 %v445_v24, %v532_v21 }
 0x13b   :  { %v147_v30 = vmul.f32 %v389_v19, %v133_v25 }
 0x13c   :  { %v447_v31 = vpop.eup %446  ;;  %v150_v36 = vmul.f32 %v389_v19, %v136_v20 }
 0x13d   :  { %v449_v32 = vpop.eup %448  ;;  %v161_v34 = vadd.f32 %v390_v27, %v147_v30  ;;  %v137_v35 = vmul.f32 %v447_v31, %v540_v29 }
 0x13e   :  { %v134_v37 = vmul.f32 %v449_v32, %v548_v38  ;;  %v164_v44 = vadd.f32 %v390_v27, %v150_v36 }
 0x13f   :  { %v168_v40 = vpack.c.bf16 %v161_v34, %v160_v33  ;;  %v151_v28 = vmul.f32 %v389_v19, %v137_v35 }
 0x140   :  { %v451_v41 = vpop.eup %450  ;;  %v148_v45 = vmul.f32 %v389_v19, %v134_v37 }
 0x141   :  { %v453_v42 = vpop.eup %452  ;;  %v135_v43 = vmul.f32 %v451_v41, %v550_v39  ;;  %424 = vmatprep.mubr.msk.bf16.mxu0 %vm34_vm0, %v168_v40  ;;  %v165_v21 = vadd.f32 %v390_v27, %v151_v28 }
 0x142   :  { %v138_v46 = vmul.f32 %v453_v42, %v558_v48  ;;  %v162_v38 = vadd.f32 %v390_v27, %v148_v45  ;;  %v391_v48 = vld [vmem:[%s697_s4] ss:$0 sm:$0xff]  ;;  %s456_s4 = smov 96  }
 0x143   :  { %v170_v47 = vpack.c.bf16 %v165_v21, %v164_v44  ;;  %v149_v50 = vmul.f32 %v389_v19, %v135_v43 }
 0x144   :  { %v455_v51 = vpop.eup %454  ;;  %v152_v53 = vmul.f32 %v389_v19, %v138_v46 }
 0x145   :  { %v139_v29 = vmul.f32 %v455_v51, %v560_v49  ;;  %428 = vmatprep.mubr.msk.bf16.mxu1 %vm34_vm0, %v170_v47  ;;  %v163_v52 = vadd.f32 %v390_v27, %v149_v50 }
 0x146   :  { %v166_v39 = vadd.f32 %v390_v27, %v152_v53 }
 0x147   :  { %v169_v54 = vpack.c.bf16 %v163_v52, %v162_v38  ;;  %v153_v55 = vmul.f32 %v389_v19, %v139_v29 }
 0x149   :  { %425 = vmatmul.mubr.msk.bf16.vlgmr.msra.gmra.mrb[0].mxu0 %vm34_vm0, %v169_v54  ;;  %v167_v56 = vadd.f32 %v390_v27, %v153_v55 }
 0x14b   :  { %v171_v57 = vpack.c.bf16 %v167_v56, %v166_v39 }
 0x14d   :  { %429 = vmatmul.mubr.msk.bf16.vlgmr.msra.gmra.mrb[0].mxu1 %vm34_vm0, %v171_v57 }
 0x21c   :  { %v426_v58 = vpop.f32.mrb[0].mxu0 }
 0x21d   :  { %v250_v49 = vadd.f32 %v426_v58, %v391_v48  ;;  %v241_v59 = vpop.f32.mrb[1].mxu0 }
 0x21e   :  { %v242_v60 = vadd.f32 %v391_v48, %v241_v59  ;;  %v427_v61 = vpop.f32.mrb[2].mxu0 }
 0x21f   :  { %v408_v62 = vpack.c.bf16 %v250_v49, %v250_v49  ;;  %v253_v63 = vadd.f32 %v427_v61, %v391_v48  ;;  %v244_v0 = vpop.f32.mrb[3].mxu0 }
 0x220   :  { %v406_v1 = vpack.c.bf16 %v242_v60, %v242_v60  ;;  %v245_v2 = vadd.f32 %v391_v48, %v244_v0  ;;  %v430_v3 = vpop.f32.mrb[0].mxu1 }
 0x221   :  { %307 = vst.msk [vmem:[%s698_s5 + $0x8] sm:$0xf] %vm304_vm1, %v408_v62  ;;  %v409_v4 = vpack.c.bf16 %v253_v63, %v253_v63  ;;  %v266_v5 = vadd.f32 %v430_v3, %v391_v48  ;;  %317 = vrot.lane.b32.xlu1 %v408_v62, %s456_s4  ;;  %v257_v6 = vpop.f32.mrb[1].mxu1 }
 0x222   :  { %305 = vst.msk [vmem:[%s698_s5] sm:$0xf] %vm304_vm1, %v406_v1  ;;  %v407_v7 = vpack.c.bf16 %v245_v2, %v245_v2  ;;  %v258_v8 = vadd.f32 %v391_v48, %v257_v6  ;;  %v431_v9 = vpop.f32.mrb[2].mxu1 }
 0x223   :  { %308 = vst.msk [vmem:[%s698_s5 + $0xc] sm:$0xf] %vm304_vm1, %v409_v4  ;;  %v412_v10 = vpack.c.bf16 %v266_v5, %v266_v5  ;;  %v269_v11 = vadd.f32 %v431_v9, %v391_v48  ;;  %v260_v12 = vpop.f32.mrb[3].mxu1 }
 0x224   :  { %306 = vst.msk [vmem:[%s698_s5 + $0x4] sm:$0xf] %vm304_vm1, %v407_v7  ;;  %v410_v13 = vpack.c.bf16 %v258_v8, %v258_v8  ;;  %v261_v14 = vadd.f32 %v391_v48, %v260_v12 }
 0x225   :  { %311 = vst.msk [vmem:[%s698_s5 + $0x18] sm:$0xf] %vm304_vm1, %v412_v10  ;;  %v413_v15 = vpack.c.bf16 %v269_v11, %v269_v11  ;;  %319 = vrot.lane.b32.xlu1 %v409_v4, %s456_s4  ;;  %325 = vrot.lane.b32.xlu0 %v412_v10, %s456_s4 }
 0x226   :  { %309 = vst.msk [vmem:[%s698_s5 + $0x10] sm:$0xf] %vm304_vm1, %v410_v13  ;;  %v411_v16 = vpack.c.bf16 %v261_v14, %v261_v14 }
 0x227   :  { %312 = vst.msk [vmem:[%s698_s5 + $0x1c] sm:$0xf] %vm304_vm1, %v413_v15 }
 0x228   :  { %310 = vst.msk [vmem:[%s698_s5 + $0x14] sm:$0xf] %vm304_vm1, %v411_v16 }
 0x229   :  { %349 = vrot.lane.b32.xlu0 %v408_v62, %s457_s16  ;;  %327 = vrot.lane.b32.xlu1 %v413_v15, %s456_s4 }
 0x22d   :  { %313 = vrot.lane.b32.xlu0 %v406_v1, %s456_s4  ;;  %351 = vrot.lane.b32.xlu1 %v409_v4, %s457_s16 }
 0x231   :  { %315 = vrot.lane.b32.xlu1 %v407_v7, %s456_s4  ;;  %321 = vrot.lane.b32.xlu0 %v410_v13, %s456_s4 }
 0x235   :  { %323 = vrot.lane.b32.xlu1 %v411_v16, %s456_s4  ;;  %345 = vrot.lane.b32.xlu0 %v406_v1, %s457_s16 }
 0x239   :  { %347 = vrot.lane.b32.xlu1 %v407_v7, %s457_s16  ;;  %353 = vrot.lane.b32.xlu0 %v410_v13, %s457_s16 }
 0x23d   :  { %355 = vrot.lane.b32.xlu1 %v411_v16, %s457_s16  ;;  %357 = vrot.lane.b32.xlu0 %v412_v10, %s457_s16 }
 0x241   :  { %359 = vrot.lane.b32.xlu1 %v413_v15, %s457_s16 }
 0x293   :  { %v318_v17 = vpop.permute.xlu1 %317 }
 0x294   :  { %339 = vst.msk [vmem:[%s699_s6 + $0x8] sm:$0xf] %vm304_vm1, %v318_v17 }
 0x297   :  { %v320_v18 = vpop.permute.xlu1 %319  ;;  %v326_v19 = vpop.permute.xlu0 %325 }
 0x298   :  { %340 = vst.msk [vmem:[%s699_s6 + $0xc] sm:$0xf] %vm304_vm1, %v320_v18  ;;  %343 = vst.msk [vmem:[%s699_s6 + $0x18] sm:$0xf] %vm304_vm1, %v326_v19 }
 0x29b   :  { %v350_v22 = vpop.permute.xlu0 %349  ;;  %v328_v23 = vpop.permute.xlu1 %327 }
 0x29c   :  { %371 = vst.msk [vmem:[%s700_s7 + $0x8] sm:$0xf] %vm304_vm1, %v350_v22  ;;  %344 = vst.msk [vmem:[%s699_s6 + $0x1c] sm:$0xf] %vm304_vm1, %v328_v23 }
 0x29f   :  { %v314_v24 = vpop.permute.xlu0 %313  ;;  %v352_v25 = vpop.permute.xlu1 %351 }
 0x2a0   :  { %337 = vst.msk [vmem:[%s699_s6] sm:$0xf] %vm304_vm1, %v314_v24  ;;  %372 = vst.msk [vmem:[%s700_s7 + $0xc] sm:$0xf] %vm304_vm1, %v352_v25 }
 0x2a3   :  { %v316_v26 = vpop.permute.xlu1 %315  ;;  %v322_v27 = vpop.permute.xlu0 %321 }
 0x2a4   :  { %338 = vst.msk [vmem:[%s699_s6 + $0x4] sm:$0xf] %vm304_vm1, %v316_v26  ;;  %341 = vst.msk [vmem:[%s699_s6 + $0x10] sm:$0xf] %vm304_vm1, %v322_v27 }
 0x2a7   :  { %v324_v20 = vpop.permute.xlu1 %323  ;;  %v346_v30 = vpop.permute.xlu0 %345 }
 0x2a8   :  { %342 = vst.msk [vmem:[%s699_s6 + $0x14] sm:$0xf] %vm304_vm1, %v324_v20  ;;  %369 = vst.msk [vmem:[%s700_s7] sm:$0xf] %vm304_vm1, %v346_v30 }
 0x2ab   :  { %v348_v31 = vpop.permute.xlu1 %347  ;;  %v354_v32 = vpop.permute.xlu0 %353 }
 0x2ac   :  { %370 = vst.msk [vmem:[%s700_s7 + $0x4] sm:$0xf] %vm304_vm1, %v348_v31  ;;  %373 = vst.msk [vmem:[%s700_s7 + $0x10] sm:$0xf] %vm304_vm1, %v354_v32 }
 0x2af   :  { %v356_v33 = vpop.permute.xlu1 %355  ;;  %v358_v34 = vpop.permute.xlu0 %357 }
 0x2b0   :  { %374 = vst.msk [vmem:[%s700_s7 + $0x14] sm:$0xf] %vm304_vm1, %v356_v33  ;;  %375 = vst.msk [vmem:[%s700_s7 + $0x18] sm:$0xf] %vm304_vm1, %v358_v34 }
 0x2b3   :  { %v360_v35 = vpop.permute.xlu1 %359 }
 0x2b4   :  { %376 = vst.msk [vmem:[%s700_s7 + $0x1c] sm:$0xf] %vm304_vm1, %v360_v35 }

// kernel: vit_forward.15
= control target key start
LH: loop header
LB: loop body
LE: loop exit
PB: predicated region body
PF: predicated region fallthrough
CT: control target
= control target key end

     0   :  { %vm25_vm0 = vcmask 254976   ;;  %s249_s0 = inlined_call_operand.vmem [shape: f32[2,32], index: 0, kind: input, shape index: {}]   ;;  %s250_s1 = inlined_call_operand.vmem [shape: f32[1,32], index: 1, kind: input, shape index: {}]   ;;  %s251_s2 = inlined_call_operand.vmem [shape: f32[1,32], index: 2, kind: input, shape index: {}]   ;;  %s252_s3 = inlined_call_operand.vmem [shape: bf16[32,10], index: 3, kind: input, shape index: {}]   ;;  %s253_s4 = inlined_call_operand.vmem [shape: f32[1,10], index: 4, kind: input, shape index: {}]   ;;  %s254_s5 = inlined_call_operand.hbm [shape: f32[2,10], index: 5, kind: output, shape index: {}]  }
   0x1   :  { %v22_v0 = vld [vmem:[%s249_s0] sm:$0x3] }
   0x2   :  { %v26_v1 = vsel %vm25_vm0, %v22_v0, 0.0 }
   0x3   :  { %27 = vadd.xlane.f32.xlu0 %v26_v1 }
   0x4   :  { %10 = vsyncpa [#allocation3], 0  ;;  %v158_v7 = vld [vmem:[%s252_s3] sm:$0xff]   ;;  %v186_v8 = vmov 0.0   ;;  %v159_v9 = vld [vmem:[%s252_s3 + $0x8] sm:$0xff]   ;;  %vm187_vm1 = vmmov 0  }
   0x5   :  { %147 = vmatprep.subr.bf16.mxu0 %v186_v8  ;;  %151 = vmatprep.mubr.msk.bf16.mxu0 %vm187_vm1, %v186_v8  ;;  %v138_v14 = vld [vmem:[%s250_s1] ss:$0 sm:$0xff]  ;;  %vm78_vm2 = vcmask 261120   ;;  %s188_s28 = smov [#allocation2]   ;;  %vm122_vm3 = vcmask 74752  }
   0x6   :  { %148 = vmatpush3.bf16.msra.mxu0 %v158_v7  ;;  %v139_v16 = vld [vmem:[%s251_s2] ss:$0 sm:$0xff]  ;;  %s130_s29 = sshll.u32 %s188_s28, 4  ;;  %s131_s29 = int_to_ptr.vmem [resolvable:$true] %s130_s29 }
   0x7   :  { %149 = vmatprep.subr.bf16.mxu0 %v186_v8  ;;  %v140_v20 = vld [vmem:[%s253_s4] ss:$0 sm:$0xff]  ;;  %s162_s1 = scalar_lea.vmem %s131_s29, 32  ;;  %p167_p1 = scmp.lt.s32.totalorder %s131_s29, %s131_s29 }
   0x8   :  { %p163_p0 = scmp.ne.s32.totalorder %s131_s29, %s162_s1  ;;  %p168_p2 = scmp.lt.s32.totalorder %s162_s1, %s162_s1 }
   0xa   :  { %150 = vmatpush3.bf16.msra.mxu0 %v159_v9  ;;  %p169_p3 = por %p168_p2, %p167_p1 }
   0xc   :  { %p170_p4 = pnand %p169_p3, %p163_p0 }
  0x90   :  { %v28_v2 = vpop.xlane.xlu0 %27 }
  0x91   :  { %v30_v3 = vmul.f32 0.03125, %v28_v2 }
  0x93   :  { %v31_v4 = vsub.f32 %v22_v0, %v30_v3 }
  0x95   :  { %v32_v5 = vmul.f32 %v31_v4, %v31_v4 }
  0x97   :  { %v33_v6 = vsel %vm25_vm0, %v32_v5, 0.0 }
  0x98   :  { %34 = vadd.xlane.f32.xlu0 %v33_v6 }
 0x125   :  { %v35_v10 = vpop.xlane.xlu0 %34 }
 0x126   :  { %v36_v11 = vmul.f32 0.03125, %v35_v10 }
 0x128   :  { %v37_v12 = vadd.f32 1e-05, %v36_v11 }
 0x12a   :  { %160 = vrsqrt.f32 %v37_v12 }
 0x134   :  { %v161_v13 = vpop.eup %160 }
 0x135   :  { %v39_v15 = vmul.f32 %v161_v13, %v31_v4 }
 0x137   :  { %v46_v17 = vmul.f32 %v138_v14, %v39_v15 }
 0x139   :  { %v53_v18 = vadd.f32 %v139_v16, %v46_v17 }
 0x13b   :  { %v54_v19 = vpack.c.bf16 %v53_v18, %v53_v18 }
 0x13d   :  { %152 = vmatmul.mubr.msk.bf16.vlgmr.msra.gmra.mrb[0].mxu0 %vm78_vm2, %v54_v19 }
 0x210   :  { %v116_v21 = vpop.f32.mrb[0].mxu0 }
 0x211   :  { %v117_v22 = vadd.f32 %v140_v20, %v116_v21  ;;  %v153_v23 = vpop.f32.mrb[1].mxu0 }
 0x212   :  { %v119_v24 = vpop.f32.mrb[2].mxu0 }
 0x213   :  { %v154_v25 = vpop.f32.mrb[3].mxu0  ;;  %123 = vst.msk [vmem:[#allocation2] sm:$0x3] %vm122_vm3, %v117_v22 }
 0x214   :  { %173 = shalt.err (!%p170_p4)
}
 0x215   :  { %s174_s4 = scalar_lea.hbm %s254_s5, 32 }
 0x216   :  { %p175_p5 = scmp.ne.s32.totalorder %s254_s5, %s174_s4  ;;  %p178_p6 = scmp.lt.u32.totalorder %s174_s4, %s254_s5 }
 0x218   :  { %p180_p7 = pnand %p178_p6, %p175_p5 }
 0x21a   :  { %183 = shalt.err (!%p180_p7)
}
 0x21b   :  { %133 = dma.vmem_to_hbm [thread:$0]  %s131_s29, 32, %s254_s5, [#allocation3]  }
 0x21c   :  { %184 = dma.done.wait [#allocation3], 32  }
 0x21d   :  { %185 = vsyncadd [#allocation3], 4294967264 }
 0x21e   :  { %137 = vsyncpa [#allocation3], 1 }

// kernel: vit_forward.11
= control target key start
LH: loop header
LB: loop body
LE: loop exit
PB: predicated region body
PF: predicated region fallthrough
CT: control target
= control target key end

     0   :  { %vm37_vm0 = vcmask 261120   ;;  %vm358_vm1 = vcmask 523264   ;;  %s784_s0 = inlined_call_operand.vmem [shape: f32[64,32], index: 0, kind: input, shape index: {}]   ;;  %s785_s3 = inlined_call_operand.vmem [shape: bf16[32,64], index: 3, kind: input, shape index: {}]   ;;  %s786_s1 = inlined_call_operand.vmem [shape: f32[1,32], index: 1, kind: input, shape index: {}]   ;;  %s787_s2 = inlined_call_operand.vmem [shape: f32[1,32], index: 2, kind: input, shape index: {}]   ;;  %s788_s5 = inlined_call_operand.vmem [shape: bf16[64,32], index: 5, kind: input, shape index: {}]   ;;  %s789_s4 = inlined_call_operand.vmem [shape: f32[1,64], index: 4, kind: input, shape index: {}]   ;;  %s790_s6 = inlined_call_operand.vmem [shape: f32[1,32], index: 6, kind: input, shape index: {}]   ;;  %s791_s7 = inlined_call_operand.vmem [shape: f32[64,32], index: 7, kind: output, shape index: {}]  }
   0x1   :  { %v597_v0 = vld [vmem:[%s784_s0] sm:$0xff]  ;;  %v602_v1 = vld [vmem:[%s784_s0 + $0x10] sm:$0xff]  ;;  %v607_v2 = vld [vmem:[%s784_s0 + $0x8] sm:$0xff] }
   0x2   :  { %v38_v3 = vsel %vm37_vm0, %v597_v0, 0.0  ;;  %v44_v4 = vsel %vm37_vm0, %v602_v1, 0.0  ;;  %v616_v5 = vld [vmem:[%s784_s0 + $0x18] sm:$0xff]  ;;  %v41_v6 = vsel %vm37_vm0, %v607_v2, 0.0  ;;  %v625_v8 = vld [vmem:[%s784_s0 + $0x20] sm:$0xff]  ;;  %v630_v9 = vld [vmem:[%s784_s0 + $0x28] sm:$0xff] }
   0x3   :  { %39 = vadd.xlane.f32.xlu0 %v38_v3  ;;  %45 = vadd.xlane.f32.xlu1 %v44_v4  ;;  %v47_v7 = vsel %vm37_vm0, %v616_v5, 0.0  ;;  %v50_v10 = vsel %vm37_vm0, %v625_v8, 0.0  ;;  %v53_v11 = vsel %vm37_vm0, %v630_v9, 0.0  ;;  %v639_v12 = vld [vmem:[%s784_s0 + $0x30] sm:$0xff]  ;;  %v644_v13 = vld [vmem:[%s784_s0 + $0x38] sm:$0xff]  ;;  %v516_v56 = vld [vmem:[%s785_s3] sm:$0xff]  }
   0x4   :  { %v56_v14 = vsel %vm37_vm0, %v639_v12, 0.0  ;;  %v59_v15 = vsel %vm37_vm0, %v644_v13, 0.0  ;;  %488 = vmatprep.subr.bf16.mxu0 %v516_v56  ;;  %v517_v57 = vld [vmem:[%s785_s3 + $0x8] sm:$0xff]  }
   0x5   :  { %489 = vmatpush3.bf16.msra.mxu0 %v516_v56 }
   0x6   :  { %490 = vmatprep.subr.bf16.mxu0 %v517_v57 }
   0x7   :  { %42 = vadd.xlane.f32.xlu0 %v41_v6  ;;  %48 = vadd.xlane.f32.xlu1 %v47_v7 }
   0x9   :  { %491 = vmatpush3.bf16.msra.mxu0 %v517_v57 }
   0xb   :  { %51 = vadd.xlane.f32.xlu0 %v50_v10  ;;  %54 = vadd.xlane.f32.xlu1 %v53_v11 }
   0xf   :  { %57 = vadd.xlane.f32.xlu0 %v56_v14  ;;  %60 = vadd.xlane.f32.xlu1 %v59_v15 }
  0x90   :  { %v40_v16 = vpop.xlane.xlu0 %39  ;;  %v46_v17 = vpop.xlane.xlu1 %45 }
  0x91   :  { %v63_v18 = vmul.f32 0.03125, %v40_v16  ;;  %v65_v19 = vmul.f32 0.03125, %v46_v17 }
  0x93   :  { %v651_v20 = vsub.f32 %v597_v0, %v63_v18  ;;  %v654_v21 = vsub.f32 %v602_v1, %v65_v19 }
  0x94   :  { %v43_v22 = vpop.xlane.xlu0 %42  ;;  %v49_v23 = vpop.xlane.xlu1 %48 }
  0x95   :  { %v64_v24 = vmul.f32 0.03125, %v43_v22  ;;  %v66_v25 = vmul.f32 0.03125, %v49_v23  ;;  %v79_v26 = vmul.f32 %v651_v20, %v651_v20  ;;  %v81_v27 = vmul.f32 %v654_v21, %v654_v21 }
  0x97   :  { %v661_v28 = vsub.f32 %v607_v2, %v64_v24  ;;  %v664_v29 = vsub.f32 %v616_v5, %v66_v25  ;;  %v87_v30 = vsel %vm37_vm0, %v79_v26, 0.0  ;;  %v93_v33 = vsel %vm37_vm0, %v81_v27, 0.0 }
  0x98   :  { %88 = vadd.xlane.f32.xlu0 %v87_v30  ;;  %v52_v31 = vpop.xlane.xlu0 %51  ;;  %v55_v32 = vpop.xlane.xlu1 %54 }
  0x99   :  { %v67_v34 = vmul.f32 0.03125, %v52_v31  ;;  %v68_v35 = vmul.f32 0.03125, %v55_v32  ;;  %v80_v36 = vmul.f32 %v661_v28, %v661_v28  ;;  %v82_v37 = vmul.f32 %v664_v29, %v664_v29  ;;  %v456_v31 = vld [vmem:[%s786_s1] ss:$0 sm:$0xff] }
  0x9b   :  { %v673_v38 = vsub.f32 %v625_v8, %v67_v34  ;;  %v676_v39 = vsub.f32 %v630_v9, %v68_v35  ;;  %v90_v40 = vsel %vm37_vm0, %v80_v36, 0.0  ;;  %v96_v43 = vsel %vm37_vm0, %v82_v37, 0.0 }
  0x9c   :  { %94 = vadd.xlane.f32.xlu0 %v93_v33  ;;  %91 = vadd.xlane.f32.xlu1 %v90_v40  ;;  %v58_v41 = vpop.xlane.xlu0 %57  ;;  %v61_v42 = vpop.xlane.xlu1 %60 }
  0x9d   :  { %v69_v44 = vmul.f32 0.03125, %v58_v41  ;;  %v70_v45 = vmul.f32 0.03125, %v61_v42  ;;  %v83_v46 = vmul.f32 %v673_v38, %v673_v38  ;;  %v84_v47 = vmul.f32 %v676_v39, %v676_v39 }
  0x9f   :  { %v685_v48 = vsub.f32 %v639_v12, %v69_v44  ;;  %v688_v49 = vsub.f32 %v644_v13, %v70_v45  ;;  %v99_v50 = vsel %vm37_vm0, %v83_v46, 0.0  ;;  %v102_v51 = vsel %vm37_vm0, %v84_v47, 0.0 }
  0xa0   :  { %97 = vadd.xlane.f32.xlu1 %v96_v43  ;;  %100 = vadd.xlane.f32.xlu0 %v99_v50 }
  0xa1   :  { %v85_v52 = vmul.f32 %v685_v48, %v685_v48  ;;  %v86_v53 = vmul.f32 %v688_v49, %v688_v49 }
  0xa3   :  { %v105_v54 = vsel %vm37_vm0, %v85_v52, 0.0  ;;  %v108_v55 = vsel %vm37_vm0, %v86_v53, 0.0 }
  0xa4   :  { %103 = vadd.xlane.f32.xlu1 %v102_v51  ;;  %106 = vadd.xlane.f32.xlu0 %v105_v54 }
  0xa8   :  { %109 = vadd.xlane.f32.xlu1 %v108_v55 }
 0x125   :  { %v89_v58 = vpop.xlane.xlu0 %88 }
 0x126   :  { %v111_v59 = vmul.f32 0.03125, %v89_v58 }
 0x128   :  { %v119_v60 = vadd.f32 1e-05, %v111_v59 }
 0x129   :  { %v92_v61 = vpop.xlane.xlu1 %91  ;;  %v95_v62 = vpop.xlane.xlu0 %94 }
 0x12a   :  { %522 = vrsqrt.f32 %v119_v60  ;;  %v112_v63 = vmul.f32 0.03125, %v92_v61  ;;  %v113_v3 = vmul.f32 0.03125, %v95_v62 }
 0x12c   :  { %v120_v4 = vadd.f32 1e-05, %v112_v63  ;;  %v121_v6 = vadd.f32 1e-05, %v113_v3 }
 0x12d   :  { %v98_v7 = vpop.xlane.xlu1 %97  ;;  %v101_v10 = vpop.xlane.xlu0 %100 }
 0x12e   :  { %524 = vrsqrt.f32 %v120_v4  ;;  %v114_v11 = vmul.f32 0.03125, %v98_v7  ;;  %v115_v14 = vmul.f32 0.03125, %v101_v10  ;;  %v521_v7 = vld [vmem:[%s788_s5 + $0x18] sm:$0xff]   ;;  %v458_v10 = vld [vmem:[%s789_s4] ss:$0 sm:$0xff] }
 0x12f   :  { %526 = vrsqrt.f32 %v121_v6  ;;  %v520_v6 = vld [vmem:[%s788_s5 + $0x10] sm:$0xff]  }
 0x130   :  { %v122_v15 = vadd.f32 1e-05, %v114_v11  ;;  %v123_v16 = vadd.f32 1e-05, %v115_v14 }
 0x131   :  { %v104_v17 = vpop.xlane.xlu1 %103  ;;  %v107_v18 = vpop.xlane.xlu0 %106 }
 0x132   :  { %528 = vrsqrt.f32 %v122_v15  ;;  %v116_v19 = vmul.f32 0.03125, %v104_v17  ;;  %v117_v22 = vmul.f32 0.03125, %v107_v18 }
 0x133   :  { %530 = vrsqrt.f32 %v123_v16 }
 0x134   :  { %v523_v23 = vpop.eup %522  ;;  %v124_v24 = vadd.f32 1e-05, %v116_v19  ;;  %v125_v25 = vadd.f32 1e-05, %v117_v22 }
 0x135   :  { %v110_v26 = vpop.xlane.xlu1 %109  ;;  %v135_v27 = vmul.f32 %v523_v23, %v651_v20  ;;  %v457_v20 = vld [vmem:[%s787_s2] ss:$0 sm:$0xff] }
 0x136   :  { %532 = vrsqrt.f32 %v124_v24  ;;  %v118_v30 = vmul.f32 0.03125, %v110_v26 }
 0x137   :  { %534 = vrsqrt.f32 %v125_v25  ;;  %v149_v36 = vmul.f32 %v456_v31, %v135_v27 }
 0x138   :  { %v525_v32 = vpop.eup %524  ;;  %v126_v33 = vadd.f32 1e-05, %v118_v30 }
 0x139   :  { %v527_v34 = vpop.eup %526  ;;  %v136_v35 = vmul.f32 %v525_v32, %v661_v28  ;;  %v163_v44 = vadd.f32 %v457_v20, %v149_v36 }
 0x13a   :  { %v137_v37 = vmul.f32 %v527_v34, %v654_v21  ;;  %536 = vrsqrt.f32 %v126_v33 }
 0x13b   :  { %v150_v40 = vmul.f32 %v456_v31, %v136_v35 }
 0x13c   :  { %v529_v41 = vpop.eup %528  ;;  %v151_v46 = vmul.f32 %v456_v31, %v137_v37 }
 0x13d   :  { %v531_v42 = vpop.eup %530  ;;  %v138_v43 = vmul.f32 %v529_v41, %v664_v29  ;;  %v164_v45 = vadd.f32 %v457_v20, %v150_v40 }
 0x13e   :  { %v139_v47 = vmul.f32 %v531_v42, %v673_v38  ;;  %v165_v53 = vadd.f32 %v457_v20, %v151_v46 }
 0x13f   :  { %v171_v50 = vpack.c.bf16 %v164_v45, %v163_v44  ;;  %v152_v28 = vmul.f32 %v456_v31, %v138_v43 }
 0x140   :  { %v533_v51 = vpop.eup %532  ;;  %v153_v55 = vmul.f32 %v456_v31, %v139_v47 }
 0x141   :  { %v535_v52 = vpop.eup %534  ;;  %v140_v21 = vmul.f32 %v533_v51, %v676_v39  ;;  %492 = vmatprep.mubr.msk.bf16.mxu0 %vm37_vm0, %v171_v50  ;;  %v166_v54 = vadd.f32 %v457_v20, %v152_v28 }
 0x142   :  { %v141_v56 = vmul.f32 %v535_v52, %v685_v48  ;;  %v167_v38 = vadd.f32 %v457_v20, %v153_v55  ;;  %v518_v48 = vld [vmem:[%s788_s5] sm:$0xff]  }
 0x143   :  { %v172_v57 = vpack.c.bf16 %v166_v54, %v165_v53  ;;  %v154_v29 = vmul.f32 %v456_v31, %v140_v21  ;;  %500 = vmatprep.subr.bf16.mxu1 %v518_v48 }
 0x144   :  { %v537_v58 = vpop.eup %536  ;;  %v155_v61 = vmul.f32 %v456_v31, %v141_v56  ;;  %501 = vmatpush3.bf16.msra.mxu1 %v518_v48 }
 0x145   :  { %v142_v59 = vmul.f32 %v537_v58, %v688_v49  ;;  %493 = vmatmul.mubr.msk.bf16.vlgmr.msra.gmra.mrb[0].mxu0 %vm37_vm0, %v172_v57  ;;  %v168_v60 = vadd.f32 %v457_v20, %v154_v29  ;;  %v519_v49 = vld [vmem:[%s788_s5 + $0x8] sm:$0xff]  }
 0x146   :  { %v169_v39 = vadd.f32 %v457_v20, %v155_v61  ;;  %502 = vmatprep.subr.bf16.mxu1 %v519_v49 }
 0x147   :  { %v173_v62 = vpack.c.bf16 %v168_v60, %v167_v38  ;;  %v156_v63 = vmul.f32 %v456_v31, %v142_v59 }
 0x148   :  { %503 = vmatpush3.bf16.msra.mxu1 %v519_v49 }
 0x149   :  { %496 = vmatprep.mubr.msk.bf16.mxu0 %vm37_vm0, %v173_v62  ;;  %v170_v3 = vadd.f32 %v457_v20, %v156_v63  ;;  %504 = vmatprep.subr.bf16.mxu1 %v520_v6 }
 0x14b   :  { %v174_v4 = vpack.c.bf16 %v170_v3, %v169_v39 }
 0x14c   :  { %505 = vmatpush3.bf16.msra.mxu1 %v520_v6 }
 0x14d   :  { %497 = vmatmul.mubr.msk.bf16.gmra.mrb[4].mxu0 %vm37_vm0, %v174_v4  ;;  %506 = vmatprep.subr.bf16.mxu1 %v521_v7 }
 0x150   :  { %507 = vmatpush3.bf16.msra.mxu1 %v521_v7 }
 0x218   :  { %v494_v11 = vpop.f32.mrb[0].mxu0 }
 0x219   :  { %v253_v14 = vadd.f32 %v494_v11, %v458_v10  ;;  %v244_v15 = vpop.f32.mrb[1].mxu0 }
 0x21a   :  { %v245_v16 = vadd.f32 %v458_v10, %v244_v15  ;;  %v495_v17 = vpop.f32.mrb[2].mxu0 }
 0x21b   :  { %v285_v18 = vmul.f32 0.70710677, %v253_v14  ;;  %v256_v19 = vadd.f32 %v495_v17, %v458_v10  ;;  %v247_v22 = vpop.f32.mrb[3].mxu0  ;;  %v277_v50 = vmul.f32 0.5, %v253_v14  ;;  %v465_v17 = vld [vmem:[%s790_s6] ss:$0 sm:$0xff] }
 0x21c   :  { %v283_v23 = vmul.f32 0.70710677, %v245_v16  ;;  %v248_v24 = vadd.f32 %v458_v10, %v247_v22  ;;  %v275_v52 = vmul.f32 0.5, %v245_v16 }
 0x21d   :  { %538 = verf.f32 %v285_v18  ;;  %v286_v25 = vmul.f32 0.70710677, %v256_v19  ;;  %v278_v28 = vmul.f32 0.5, %v256_v19 }
 0x21e   :  { %540 = verf.f32 %v283_v23  ;;  %v284_v26 = vmul.f32 0.70710677, %v248_v24  ;;  %v276_v21 = vmul.f32 0.5, %v248_v24 }
 0x21f   :  { %542 = verf.f32 %v286_v25 }
 0x220   :  { %544 = verf.f32 %v284_v26  ;;  %v498_v27 = vpop.f32.mrb[4].mxu0 }
 0x221   :  { %v269_v30 = vadd.f32 %v498_v27, %v458_v10  ;;  %v260_v31 = vpop.f32.mrb[5].mxu0 }
 0x222   :  { %v261_v32 = vadd.f32 %v458_v10, %v260_v31  ;;  %v499_v33 = vpop.f32.mrb[6].mxu0 }
 0x223   :  { %v289_v34 = vmul.f32 0.70710677, %v269_v30  ;;  %v272_v35 = vadd.f32 %v499_v33, %v458_v10  ;;  %v263_v36 = vpop.f32.mrb[7].mxu0  ;;  %v281_v39 = vmul.f32 0.5, %v269_v30 }
 0x224   :  { %v287_v37 = vmul.f32 0.70710677, %v261_v32  ;;  %v264_v20 = vadd.f32 %v458_v10, %v263_v36  ;;  %v279_v48 = vmul.f32 0.5, %v261_v32 }
 0x225   :  { %546 = verf.f32 %v289_v34  ;;  %v290_v40 = vmul.f32 0.70710677, %v272_v35  ;;  %v282_v3 = vmul.f32 0.5, %v272_v35 }
 0x226   :  { %548 = verf.f32 %v287_v37  ;;  %v288_v41 = vmul.f32 0.70710677, %v264_v20  ;;  %v280_v49 = vmul.f32 0.5, %v264_v20 }
 0x227   :  { %v539_v42 = vpop.eup %538  ;;  %550 = verf.f32 %v290_v40 }
 0x228   :  { %v541_v43 = vpop.eup %540  ;;  %v301_v44 = vadd.f32 1.0, %v539_v42  ;;  %552 = verf.f32 %v288_v41 }
 0x229   :  { %v543_v45 = vpop.eup %542  ;;  %v299_v46 = vadd.f32 1.0, %v541_v43 }
 0x22a   :  { %v545_v47 = vpop.eup %544  ;;  %v302_v51 = vadd.f32 1.0, %v543_v45  ;;  %v309_v54 = vmul.f32 %v301_v44, %v277_v50 }
 0x22b   :  { %v300_v53 = vadd.f32 1.0, %v545_v47  ;;  %v307_v56 = vmul.f32 %v299_v46, %v275_v52 }
 0x22c   :  { %v310_v55 = vmul.f32 %v302_v51, %v278_v28 }
 0x22d   :  { %v308_v57 = vmul.f32 %v300_v53, %v276_v21 }
 0x22e   :  { %v316_v29 = vpack.c.bf16 %v310_v55, %v309_v54 }
 0x22f   :  { %v547_v58 = vpop.eup %546  ;;  %v315_v59 = vpack.c.bf16 %v308_v57, %v307_v56 }
 0x230   :  { %v549_v38 = vpop.eup %548  ;;  %v305_v60 = vadd.f32 1.0, %v547_v58 }
 0x231   :  { %v551_v61 = vpop.eup %550  ;;  %v303_v62 = vadd.f32 1.0, %v549_v38  ;;  %508 = vmatprep.mubr.msk.bf16.mxu1 %vm358_vm1, %v315_v59 }
 0x232   :  { %v553_v63 = vpop.eup %552  ;;  %v306_v4 = vadd.f32 1.0, %v551_v61  ;;  %509 = vmatmul.mubr.msk.bf16.vlgmr.msra.gmra.mrb[0].mxu1 %vm358_vm1, %v316_v29  ;;  %v313_v7 = vmul.f32 %v305_v60, %v281_v39 }
 0x233   :  { %v304_v6 = vadd.f32 1.0, %v553_v63  ;;  %v311_v11 = vmul.f32 %v303_v62, %v279_v48 }
 0x234   :  { %v314_v10 = vmul.f32 %v306_v4, %v282_v3 }
 0x235   :  { %v312_v14 = vmul.f32 %v304_v6, %v280_v49 }
 0x236   :  { %v318_v15 = vpack.c.bf16 %v314_v10, %v313_v7 }
 0x237   :  { %v317_v16 = vpack.c.bf16 %v312_v14, %v311_v11 }
 0x239   :  { %512 = vmatprep.mubr.msk.bf16.mxu1 %vm358_vm1, %v317_v16 }
 0x23a   :  { %513 = vmatmul.mubr.msk.bf16.gmra.mrb[4].mxu1 %vm358_vm1, %v318_v15 }
 0x305   :  { %v510_v18 = vpop.f32.mrb[0].mxu1 }
 0x306   :  { %v414_v19 = vadd.f32 %v510_v18, %v465_v17  ;;  %v405_v22 = vpop.f32.mrb[1].mxu1 }
 0x307   :  { %v406_v23 = vadd.f32 %v465_v17, %v405_v22  ;;  %v511_v24 = vpop.f32.mrb[2].mxu1 }
 0x308   :  { %v438_v25 = vadd.f32 %v414_v19, %v602_v1  ;;  %v417_v26 = vadd.f32 %v511_v24, %v465_v17  ;;  %v408_v27 = vpop.f32.mrb[3].mxu1 }
 0x309   :  { %v436_v30 = vadd.f32 %v406_v23, %v597_v0  ;;  %v409_v31 = vadd.f32 %v465_v17, %v408_v27 }
 0x30a   :  { %446 = vst.msk [vmem:[%s791_s7 + $0x10] sm:$0xff] %vm37_vm0, %v438_v25  ;;  %v439_v32 = vadd.f32 %v417_v26, %v616_v5 }
 0x30b   :  { %444 = vst.msk [vmem:[%s791_s7] sm:$0xff] %vm37_vm0, %v436_v30  ;;  %v437_v33 = vadd.f32 %v409_v31, %v607_v2 }
 0x30c   :  { %447 = vst.msk [vmem:[%s791_s7 + $0x18] sm:$0xff] %vm37_vm0, %v439_v32 }
 0x30d   :  { %445 = vst.msk [vmem:[%s791_s7 + $0x8] sm:$0xff] %vm37_vm0, %v437_v33  ;;  %v514_v0 = vpop.f32.mrb[4].mxu1 }
 0x30e   :  { %v430_v1 = vadd.f32 %v514_v0, %v465_v17  ;;  %v421_v5 = vpop.f32.mrb[5].mxu1 }
 0x30f   :  { %v422_v34 = vadd.f32 %v465_v17, %v421_v5  ;;  %v515_v35 = vpop.f32.mrb[6].mxu1 }
 0x310   :  { %v442_v36 = vadd.f32 %v430_v1, %v639_v12  ;;  %v433_v37 = vadd.f32 %v515_v35, %v465_v17  ;;  %v424_v20 = vpop.f32.mrb[7].mxu1 }
 0x311   :  { %v440_v2 = vadd.f32 %v422_v34, %v625_v8  ;;  %v425_v40 = vadd.f32 %v465_v17, %v424_v20 }
 0x312   :  { %450 = vst.msk [vmem:[%s791_s7 + $0x30] sm:$0xff] %vm37_vm0, %v442_v36  ;;  %v443_v41 = vadd.f32 %v433_v37, %v644_v13 }
 0x313   :  { %448 = vst.msk [vmem:[%s791_s7 + $0x20] sm:$0xff] %vm37_vm0, %v440_v2  ;;  %v441_v42 = vadd.f32 %v425_v40, %v630_v9 }
 0x314   :  { %451 = vst.msk [vmem:[%s791_s7 + $0x38] sm:$0xff] %vm37_vm0, %v443_v41 }
 0x315   :  { %449 = vst.msk [vmem:[%s791_s7 + $0x28] sm:$0xff] %vm37_vm0, %v441_v42 }

// kernel: vit_forward.10
= control target key start
LH: loop header
LB: loop body
LE: loop exit
PB: predicated region body
PF: predicated region fallthrough
CT: control target
= control target key end

     0   :  { %s1805_s21 = smov 0   ;;  %s1807_s22 = smov 0   ;;  %s2061_s0 = inlined_call_operand.vmem [shape: bf16[64,32], index: 0, kind: input, shape index: {}]   ;;  %s2062_s1 = inlined_call_operand.vmem [shape: bf16[64,32], index: 1, kind: input, shape index: {}]   ;;  %s2063_s2 = inlined_call_operand.vmem [shape: bf16[64,32], index: 2, kind: input, shape index: {}]   ;;  %s2064_s3 = inlined_call_operand.vmem [shape: f32[64,32], index: 3, kind: input, shape index: {}]   ;;  %s2065_s4 = inlined_call_operand.vmem [shape: bf16[32,32], index: 4, kind: input, shape index: {}]   ;;  %s2066_s5 = inlined_call_operand.vmem [shape: f32[1,32], index: 5, kind: input, shape index: {}]   ;;  %s2067_s6 = inlined_call_operand.vmem [shape: f32[64,32], index: 6, kind: output, shape index: {}]  }
   0x1   :  { %s1809_s23 = smov 0  }
   0x2 LB: > { %s28_s24 = sadd.s32 1, %s1756_s22  ;;  %p1450_p0 = scmp.ge.s32.totalorder %s1760_s23, 1  ;;  %s1760_s23 = sphi %s1809_s23, %s16_s23   ;;  %s1756_s22 = sphi %s1807_s22, %s2069_s22   ;;  %s1752_s21 = sphi %s1805_s21, %s2068_s21  }
   0x3   : > { %p30_p1 = scmp.ge.s32.totalorder %s28_s24, 2  ;;  %p284_p2 = scmp.lt.s32.totalorder %s1760_s23, 3 }
   0x5   : > { %s2071_s24 = smov (%p30_p1, %s28_s24), 0  ;;  %p285_p3 = pnand %p1450_p0, %p284_p2 }
   0x6   : > { %s1451_s25 = sshll.u32 (!%p285_p3), %s1752_s21, 2  ;;  %vm435_vm0 = vcmask (!%p285_p3), 64512   ;;  %v399_v14 = vlaneseq (!%p285_p3)  ;;  %v1762_v16 = vmov (!%p285_p3), -1e+30   ;;  %vm394_vm2 = vcmask (!%p285_p3), 261120   ;;  %s1763_s12 = smov (!%p285_p3), 120  }
   0x7   : > { %288 = sbr.rel (%p285_p3) target bundleno = 2821 (0xb05), region = 44  ;;  %p344_p4 = scmp.lt.s32.totalorder (!%p285_p3), %s1451_s25, 7  ;;  %vm1195_vm3 = vcmask (!%p285_p3), 130048   ;;  %vm1200_vm4 = vcmask (!%p285_p3), 195584  }
   0x8   : > { %v400_v15 = vand.u32 (!%p285_p3), 127, %v399_v14  ;;  %s1764_s13 = smov (!%p285_p3), 112   ;;  %s1765_s14 = smov (!%p285_p3), 104  }
   0x9   : > { %s1766_s15 = smov (!%p285_p3), 8   ;;  %s1767_s16 = smov (!%p285_p3), 16  }
   0xa   : > { %vm401_vm1 = vcmp.lt.s32.totalorder (!%p285_p3), %v400_v15, 17  ;;  %s1769_s21 = smov (!%p285_p3), 24  }
   0xb   : > { %v1856_v17 = vsel (!%p285_p3), %vm401_vm1, 0.0, %v1762_v16 }
   0xe   : > { %s2073_s25 = smov (!%p344_p4, %s1451_s25), 7 }
   0xf   : > { %s1826_s26 = sshll.u32 %s2073_s25, 2 }
  0x10   : > { %s359_s29 = scalar_lea.vmem %s2062_s1, %s1826_s26  ;;  %s350_s8 = scalar_lea.vmem %s2061_s0, %s1826_s26 }
  0x11   : > { %v1832_v0 = vld [vmem:[%s359_s29] sm:$0xff]   ;;  %v1842_v2 = vld [vmem:[%s359_s29 + $0x8] sm:$0xff]   ;;  %s368_s11 = scalar_lea.vmem %s2063_s2, %s1826_s26  ;;  %s1458_s26 = sshll.u32 %s2073_s25, 3 }
  0x12   : > { %1598 = vmatprep.subr.msk.bf16.mxu0 %vm435_vm0, %v1832_v0  ;;  %v443_v1 = vsel %vm435_vm0, %v1832_v0, 0  ;;  %v403_v3 = vld [vmem:[%s350_s8] sm:$0xf]  ;;  %v404_v4 = vld [vmem:[%s350_s8 + $0x4] sm:$0xf]  ;;  %v446_v10 = vsel %vm435_vm0, %v1842_v2, 0  ;;  %s374_s29 = scalar_lea.vmem %s2064_s3, %s1458_s26  ;;  %s386_s25 = scalar_lea.vmem %s2067_s6, %s1458_s26 }
  0x13   : > { %1527 = vmatpush3.bf16.xpose.msra.mxu0 %v443_v1  ;;  %v407_v5 = vmul.bf16 1052065461, %v403_v3  ;;  %v408_v6 = vmul.bf16 1052065461, %v404_v4  ;;  %v405_v8 = vld [vmem:[%s350_s8 + $0x8] sm:$0xf] }
  0x14   : > { %1599 = vmatprep.subr.msk.bf16.mxu0 %vm435_vm0, %v1842_v2  ;;  %v406_v9 = vld [vmem:[%s350_s8 + $0xc] sm:$0xf]  ;;  %v409_v11 = vmul.bf16 1052065461, %v405_v8  ;;  %v1874_v50 = vld [vmem:[%s368_s11] sm:$0xff]  }
  0x15   : > { %v1846_v7 = vcombine.low %v407_v5, %v408_v6  ;;  %v410_v12 = vmul.bf16 1052065461, %v406_v9  ;;  %v1876_v51 = vld [vmem:[%s368_s11 + $0x8] sm:$0xff]   ;;  %1534 = vmatprep.subr.bf16.mxu1 %v1874_v50 }
  0x16   : > { %1535 = vmatpush3.bf16.msra.mxu1 %v1874_v50 }
  0x17   : > { %1530 = vmatprep.mubr.msk.bf16.mxu0 %vm435_vm0, %v1846_v7  ;;  %v1852_v13 = vcombine.low %v409_v11, %v410_v12  ;;  %1536 = vmatprep.subr.bf16.mxu1 %v1876_v51 }
  0x1a   : > { %1537 = vmatpush3.bf16.msra.mxu1 %v1876_v51 }
  0x1b   : > { %1529 = vmatpush3.bf16.xpose.msra.mxu0 %v446_v10 }
  0x22   : > { %1531 = vmatmul.mubr.msk.bf16.vlgmr.msra.gmra.mrb[0].mxu0 %vm435_vm0, %v1852_v13 }
  0xf5   : > { %v1532_v18 = vpop.f32.mrb[0].mxu0 }
  0xf6   : > { %v491_v19 = vadd.f32 %v1532_v18, %v1856_v17  ;;  %v482_v20 = vpop.f32.mrb[1].mxu0 }
  0xf7   : > { %v483_v21 = vadd.f32 %v482_v20, %v1856_v17  ;;  %v1533_v22 = vpop.f32.mrb[2].mxu0 }
  0xf8   : > { %v494_v23 = vadd.f32 %v1533_v22, %v1856_v17  ;;  %v485_v24 = vpop.f32.mrb[3].mxu0  ;;  %v504_v25 = vsel %vm394_vm2, %v491_v19, -inf }
  0xf9   : > { %v486_v26 = vadd.f32 %v485_v24, %v1856_v17  ;;  %505 = vmax.xlane.f32.xlu1 %v504_v25  ;;  %v498_v27 = vsel %vm394_vm2, %v483_v21, -inf }
  0xfa   : > { %499 = vmax.xlane.f32.xlu0 %v498_v27  ;;  %v507_v28 = vsel %vm394_vm2, %v494_v23, -inf }
  0xfb   : > { %v501_v29 = vsel %vm394_vm2, %v486_v26, -inf }
  0xfd   : > { %508 = vmax.xlane.f32.xlu1 %v507_v28 }
  0xfe   : > { %502 = vmax.xlane.f32.xlu0 %v501_v29 }
 0x186   : > { %v506_v30 = vpop.xlane.xlu1 %505 }
 0x187   : > { %v512_v31 = vsub.f32 %v491_v19, %v506_v30  ;;  %v500_v32 = vpop.xlane.xlu0 %499 }
 0x188   : > { %v510_v33 = vsub.f32 %v483_v21, %v500_v32 }
 0x189   : > { %v518_v34 = vmul.f32 1.442695, %v512_v31 }
 0x18a   : > { %v514_v35 = vmul.f32 1.442695, %v510_v33  ;;  %v509_v36 = vpop.xlane.xlu1 %508 }
 0x18b   : > { %1674 = vpow2.f32 %v518_v34  ;;  %v513_v37 = vsub.f32 %v494_v23, %v509_v36  ;;  %v503_v38 = vpop.xlane.xlu0 %502 }
 0x18c   : > { %v511_v39 = vsub.f32 %v486_v26, %v503_v38  ;;  %1676 = vpow2.f32 %v514_v35 }
 0x18d   : > { %v520_v40 = vmul.f32 1.442695, %v513_v37 }
 0x18e   : > { %v516_v41 = vmul.f32 1.442695, %v511_v39 }
 0x190   : > { %1678 = vpow2.f32 %v516_v41 }
 0x191   : > { %1680 = vpow2.f32 %v520_v40 }
 0x195   : > { %v1675_v42 = vpop.eup %1674 }
 0x196   : > { %v528_v43 = vsel %vm394_vm2, %v1675_v42, 0.0  ;;  %v1677_v44 = vpop.eup %1676 }
 0x197   : > { %529 = vadd.xlane.f32.xlu0 %v528_v43  ;;  %v522_v46 = vsel %vm394_vm2, %v1677_v44, 0.0 }
 0x19a   : > { %v1679_v45 = vpop.eup %1678 }
 0x19b   : > { %523 = vadd.xlane.f32.xlu0 %v522_v46  ;;  %v525_v47 = vsel %vm394_vm2, %v1679_v45, 0.0  ;;  %v1681_v48 = vpop.eup %1680 }
 0x19c   : > { %526 = vadd.xlane.f32.xlu1 %v525_v47  ;;  %v531_v49 = vsel %vm394_vm2, %v1681_v48, 0.0 }
 0x1a0   : > { %532 = vadd.xlane.f32.xlu1 %v531_v49 }
 0x1b1   : > { %619 = vrot.lane.b32.xlu0 %v1832_v0, %s1763_s12  ;;  %621 = vrot.lane.b32.xlu1 %v1842_v2, %s1763_s12 }
 0x1b5   : > { %615 = vrot.lane.b32.xlu1 %v1846_v7, %s1763_s12 }
 0x1b9   : > { %617 = vrot.lane.b32.xlu1 %v1852_v13, %s1763_s12 }
 0x224   : > { %v530_v52 = vpop.xlane.xlu0 %529 }
 0x228   : > { %v524_v53 = vpop.xlane.xlu0 %523 }
 0x229   : > { %1682 = vrcp.f32 %v524_v53  ;;  %v527_v54 = vpop.xlane.xlu1 %526 }
 0x22a   : > { %1684 = vrcp.f32 %v527_v54 }
 0x22b   : > { %1686 = vrcp.f32 %v530_v52 }
 0x22c   : > { %v620_v55 = vpop.permute.xlu0 %619 }
 0x22d   : > { %v533_v56 = vpop.xlane.xlu1 %532  ;;  %1600 = vmatprep.subr.msk.bf16.mxu1 %vm435_vm0, %v620_v55  ;;  %v630_v5 = vsel %vm435_vm0, %v620_v55, 0 }
 0x22e   : > { %1688 = vrcp.f32 %v533_v56 }
 0x231   : > { %v622_v61 = vpop.permute.xlu1 %621 }
 0x232   : > { %v633_v9 = vsel %vm435_vm0, %v622_v61, 0 }
 0x233   : > { %v1683_v57 = vpop.eup %1682 }
 0x234   : > { %v1685_v58 = vpop.eup %1684  ;;  %v538_v59 = vmul.f32 %v1683_v57, %v1677_v44 }
 0x235   : > { %v539_v60 = vmul.f32 %v1685_v58, %v1679_v45  ;;  %v1687_v62 = vpop.eup %1686  ;;  %v616_v8 = vpop.permute.xlu1 %615 }
 0x236   : > { %v540_v3 = vmul.f32 %v1687_v62, %v1675_v42 }
 0x237   : > { %v542_v63 = vpack.c.bf16 %v539_v60, %v538_v59 }
 0x238   : > { %v1689_v1 = vpop.eup %1688 }
 0x239   : > { %1538 = vmatprep.mubr.msk.bf16.mxu1 %vm394_vm2, %v542_v63  ;;  %v541_v4 = vmul.f32 %v1689_v1, %v1681_v48  ;;  %v618_v10 = vpop.permute.xlu1 %617 }
 0x23b   : > { %v543_v6 = vpack.c.bf16 %v541_v4, %v540_v3 }
 0x23d   : > { %1539 = vmatmul.mubr.msk.bf16.vlgmr.msra.gmra.mrb[0].mxu1 %vm394_vm2, %v543_v6 }
 0x23e   : > { %1543 = vmatpush3.bf16.xpose.msra.mxu1 %v630_v5  ;;  %1546 = vmatprep.mubr.msk.bf16.mxu1 %vm435_vm0, %v616_v8 }
 0x23f   : > { %1601 = vmatprep.subr.msk.bf16.mxu1 %vm435_vm0, %v622_v61 }
 0x246   : > { %1545 = vmatpush3.bf16.xpose.msra.mxu1 %v633_v9 }
 0x24d   : > { %1547 = vmatmul.mubr.msk.bf16.vlgmr.msra.gmra.mrb[4].mxu1 %vm435_vm0, %v618_v10 }
 0x310   : > { %v1898_v11 = vpop.f32.mrb[0].mxu1 }
 0x311   : > { %v1900_v12 = vpop.f32.mrb[1].mxu1 }
 0x312   : > { %v1902_v14 = vpop.f32.mrb[2].mxu1 }
 0x313   : > { %v1904_v15 = vpop.f32.mrb[3].mxu1 }
 0x320   : > { %v1548_v16 = vpop.f32.mrb[4].mxu1 }
 0x321   : > { %v669_v18 = vpop.f32.mrb[5].mxu1  ;;  %v678_v22 = vadd.f32 %v1548_v16, %v1856_v17 }
 0x322   : > { %v670_v19 = vadd.f32 %v669_v18, %v1856_v17  ;;  %v1549_v20 = vpop.f32.mrb[6].mxu1 }
 0x323   : > { %v672_v21 = vpop.f32.mrb[7].mxu1  ;;  %v681_v26 = vadd.f32 %v1549_v20, %v1856_v17  ;;  %v690_v27 = vsel %vm394_vm2, %v678_v22, -inf }
 0x324   : > { %v673_v23 = vadd.f32 %v672_v21, %v1856_v17  ;;  %v684_v24 = vsel %vm394_vm2, %v670_v19, -inf }
 0x325   : > { %685 = vmax.xlane.f32.xlu0 %v684_v24  ;;  %v693_v28 = vsel %vm394_vm2, %v681_v26, -inf }
 0x326   : > { %v687_v25 = vsel %vm394_vm2, %v673_v23, -inf }
 0x327   : > { %688 = vmax.xlane.f32.xlu1 %v687_v25 }
 0x329   : > { %691 = vmax.xlane.f32.xlu0 %v690_v27 }
 0x32d   : > { %694 = vmax.xlane.f32.xlu0 %v693_v28 }
 0x338   : > { %732 = vrot.lane.b32.xlu1 %v1876_v51, %s1763_s12 }
 0x3b2   : > { %v686_v29 = vpop.xlane.xlu0 %685 }
 0x3b3   : > { %v696_v30 = vsub.f32 %v670_v19, %v686_v29 }
 0x3b4   : > { %v689_v31 = vpop.xlane.xlu1 %688 }
 0x3b5   : > { %v700_v34 = vmul.f32 1.442695, %v696_v30  ;;  %v697_v35 = vsub.f32 %v673_v23, %v689_v31 }
 0x3b6   : > { %v692_v32 = vpop.xlane.xlu0 %691 }
 0x3b7   : > { %v698_v33 = vsub.f32 %v678_v22, %v692_v32  ;;  %v702_v39 = vmul.f32 1.442695, %v697_v35 }
 0x3b8   : > { %v733_v49 = vpop.permute.xlu1 %732 }
 0x3b9   : > { %v704_v36 = vmul.f32 1.442695, %v698_v33 }
 0x3ba   : > { %v695_v37 = vpop.xlane.xlu0 %694 }
 0x3bb   : > { %1690 = vpow2.f32 %v704_v36  ;;  %v699_v38 = vsub.f32 %v681_v26, %v695_v37 }
 0x3bc   : > { %1692 = vpow2.f32 %v700_v34 }
 0x3bd   : > { %v706_v40 = vmul.f32 1.442695, %v699_v38 }
 0x3bf   : > { %1694 = vpow2.f32 %v706_v40 }
 0x3c0   : > { %1696 = vpow2.f32 %v702_v39 }
 0x3c5   : > { %v1691_v41 = vpop.eup %1690 }
 0x3c6   : > { %v714_v42 = vsel %vm394_vm2, %v1691_v41, 0.0  ;;  %v1693_v43 = vpop.eup %1692 }
 0x3c7   : > { %715 = vadd.xlane.f32.xlu0 %v714_v42  ;;  %v708_v45 = vsel %vm394_vm2, %v1693_v43, 0.0 }
 0x3c9   : > { %v1695_v44 = vpop.eup %1694 }
 0x3ca   : > { %v717_v46 = vsel %vm394_vm2, %v1695_v44, 0.0  ;;  %v1697_v47 = vpop.eup %1696 }
 0x3cb   : > { %709 = vadd.xlane.f32.xlu0 %v708_v45  ;;  %718 = vadd.xlane.f32.xlu1 %v717_v46  ;;  %v711_v48 = vsel %vm394_vm2, %v1697_v47, 0.0 }
 0x3cf   : > { %712 = vadd.xlane.f32.xlu1 %v711_v48 }
 0x3e0   : > { %795 = vrot.lane.b32.xlu1 %v1832_v0, %s1764_s13 }
 0x3e1   : > { %730 = vrot.lane.b32.xlu0 %v1874_v50, %s1763_s12 }
 0x3e4   : > { %797 = vrot.lane.b32.xlu1 %v1842_v2, %s1764_s13 }
 0x3e5   : > { %791 = vrot.lane.b32.xlu0 %v1846_v7, %s1764_s13 }
 0x3e8   : > { %793 = vrot.lane.b32.xlu1 %v1852_v13, %s1764_s13 }
 0x454   : > { %v716_v52 = vpop.xlane.xlu0 %715 }
 0x458   : > { %v719_v53 = vpop.xlane.xlu1 %718  ;;  %v710_v54 = vpop.xlane.xlu0 %709 }
 0x459   : > { %1698 = vrcp.f32 %v719_v53 }
 0x45a   : > { %1700 = vrcp.f32 %v710_v54 }
 0x45b   : > { %1702 = vrcp.f32 %v716_v52 }
 0x45c   : > { %v713_v55 = vpop.xlane.xlu1 %712  ;;  %v731_v56 = vpop.permute.xlu0 %730 }
 0x45d   : > { %1704 = vrcp.f32 %v713_v55  ;;  %1550 = vmatprep.subr.bf16.mxu0 %v731_v56 }
 0x45e   : > { %1551 = vmatpush3.bf16.msra.mxu0 %v731_v56 }
 0x45f   : > { %1552 = vmatprep.subr.bf16.mxu0 %v733_v49 }
 0x460   : > { %v796_v57 = vpop.permute.xlu1 %795  ;;  %v792_v8 = vpop.permute.xlu0 %791 }
 0x461   : > { %v806_v5 = vsel %vm435_vm0, %v796_v57, 0 }
 0x462   : > { %1553 = vmatpush3.bf16.msra.mxu0 %v733_v49 }
 0x463   : > { %1602 = vmatprep.subr.msk.bf16.mxu0 %vm435_vm0, %v796_v57  ;;  %v1699_v58 = vpop.eup %1698 }
 0x464   : > { %v1701_v59 = vpop.eup %1700  ;;  %v727_v62 = vmul.f32 %v1699_v58, %v1695_v44  ;;  %v798_v9 = vpop.permute.xlu1 %797 }
 0x465   : > { %v1703_v60 = vpop.eup %1702  ;;  %v724_v63 = vmul.f32 %v1701_v59, %v1693_v43  ;;  %v809_v10 = vsel %vm435_vm0, %v798_v9, 0 }
 0x466   : > { %v726_v3 = vmul.f32 %v1703_v60, %v1691_v41 }
 0x467   : > { %v1705_v61 = vpop.eup %1704 }
 0x468   : > { %v725_v1 = vmul.f32 %v1705_v61, %v1697_v47  ;;  %v729_v6 = vpack.c.bf16 %v727_v62, %v726_v3  ;;  %v794_v16 = vpop.permute.xlu1 %793 }
 0x46a   : > { %v728_v4 = vpack.c.bf16 %v725_v1, %v724_v63 }
 0x46c   : > { %1554 = vmatprep.mubr.msk.bf16.mxu0 %vm394_vm2, %v728_v4 }
 0x46d   : > { %1555 = vmatmul.mubr.msk.bf16.vlgmr.msra.gmra.mrb[4].mxu0 %vm394_vm2, %v729_v6 }
 0x46e   : > { %1559 = vmatpush3.bf16.xpose.msra.mxu0 %v806_v5  ;;  %1562 = vmatprep.mubr.msk.bf16.mxu0 %vm435_vm0, %v792_v8 }
 0x46f   : > { %1603 = vmatprep.subr.msk.bf16.mxu0 %vm435_vm0, %v798_v9 }
 0x476   : > { %1561 = vmatpush3.bf16.xpose.msra.mxu0 %v809_v10 }
 0x47d   : > { %1563 = vmatmul.mubr.msk.bf16.vlgmr.msra.gmra.mrb[8].mxu0 %vm435_vm0, %v794_v16 }
 0x540   : > { %v1938_v18 = vpop.f32.mrb[4].mxu0 }
 0x541   : > { %v1940_v19 = vpop.f32.mrb[5].mxu0 }
 0x542   : > { %v1942_v20 = vpop.f32.mrb[6].mxu0 }
 0x543   : > { %v1643_v21 = vpack.i.bf16 %v1942_v20, %v1938_v18  ;;  %v1946_v22 = vpop.f32.mrb[7].mxu0 }
 0x544   : > { %v1638_v23 = vpack.i.bf16 %v1946_v22, %v1940_v19 }
 0x550   : > { %v1564_v24 = vpop.f32.mrb[8].mxu0 }
 0x551   : > { %v845_v25 = vpop.f32.mrb[9].mxu0  ;;  %v854_v29 = vadd.f32 %v1564_v24, %v1856_v17 }
 0x552   : > { %v846_v26 = vadd.f32 %v845_v25, %v1856_v17  ;;  %v1565_v27 = vpop.f32.mrb[10].mxu0 }
 0x553   : > { %v848_v28 = vpop.f32.mrb[11].mxu0  ;;  %v857_v33 = vadd.f32 %v1565_v27, %v1856_v17  ;;  %v866_v34 = vsel %vm394_vm2, %v854_v29, -inf }
 0x554   : > { %v849_v30 = vadd.f32 %v848_v28, %v1856_v17  ;;  %v860_v31 = vsel %vm394_vm2, %v846_v26, -inf }
 0x555   : > { %861 = vmax.xlane.f32.xlu0 %v860_v31  ;;  %v869_v35 = vsel %vm394_vm2, %v857_v33, -inf }
 0x556   : > { %v863_v32 = vsel %vm394_vm2, %v849_v30, -inf }
 0x557   : > { %864 = vmax.xlane.f32.xlu1 %v863_v32 }
 0x559   : > { %867 = vmax.xlane.f32.xlu0 %v866_v34 }
 0x55d   : > { %870 = vmax.xlane.f32.xlu0 %v869_v35 }
 0x568   : > { %908 = vrot.lane.b32.xlu1 %v1876_v51, %s1764_s13 }
 0x5e2   : > { %v862_v36 = vpop.xlane.xlu0 %861 }
 0x5e3   : > { %v872_v37 = vsub.f32 %v846_v26, %v862_v36 }
 0x5e4   : > { %v865_v38 = vpop.xlane.xlu1 %864 }
 0x5e5   : > { %v876_v41 = vmul.f32 1.442695, %v872_v37  ;;  %v873_v42 = vsub.f32 %v849_v30, %v865_v38 }
 0x5e6   : > { %v868_v39 = vpop.xlane.xlu0 %867 }
 0x5e7   : > { %v874_v40 = vsub.f32 %v854_v29, %v868_v39  ;;  %v878_v46 = vmul.f32 1.442695, %v873_v42 }
 0x5e8   : > { %v909_v58 = vpop.permute.xlu1 %908 }
 0x5e9   : > { %v880_v43 = vmul.f32 1.442695, %v874_v40 }
 0x5ea   : > { %v871_v44 = vpop.xlane.xlu0 %870 }
 0x5eb   : > { %1706 = vpow2.f32 %v880_v43  ;;  %v875_v45 = vsub.f32 %v857_v33, %v871_v44 }
 0x5ec   : > { %1708 = vpow2.f32 %v876_v41 }
 0x5ed   : > { %v882_v47 = vmul.f32 1.442695, %v875_v45 }
 0x5ef   : > { %1710 = vpow2.f32 %v882_v47 }
 0x5f0   : > { %1712 = vpow2.f32 %v878_v46 }
 0x5f5   : > { %v1707_v48 = vpop.eup %1706 }
 0x5f6   : > { %v890_v49 = vsel %vm394_vm2, %v1707_v48, 0.0  ;;  %v1709_v52 = vpop.eup %1708 }
 0x5f7   : > { %891 = vadd.xlane.f32.xlu0 %v890_v49  ;;  %v884_v54 = vsel %vm394_vm2, %v1709_v52, 0.0 }
 0x5f9   : > { %v1711_v53 = vpop.eup %1710 }
 0x5fa   : > { %v893_v55 = vsel %vm394_vm2, %v1711_v53, 0.0  ;;  %v1713_v56 = vpop.eup %1712 }
 0x5fb   : > { %885 = vadd.xlane.f32.xlu0 %v884_v54  ;;  %894 = vadd.xlane.f32.xlu1 %v893_v55  ;;  %v887_v57 = vsel %vm394_vm2, %v1713_v56, 0.0 }
 0x5ff   : > { %888 = vadd.xlane.f32.xlu1 %v887_v57 }
 0x610   : > { %971 = vrot.lane.b32.xlu1 %v1832_v0, %s1765_s14 }
 0x611   : > { %906 = vrot.lane.b32.xlu0 %v1874_v50, %s1764_s13 }
 0x614   : > { %973 = vrot.lane.b32.xlu1 %v1842_v2, %s1765_s14 }
 0x615   : > { %967 = vrot.lane.b32.xlu0 %v1846_v7, %s1765_s14 }
 0x618   : > { %969 = vrot.lane.b32.xlu1 %v1852_v13, %s1765_s14 }
 0x684   : > { %v892_v59 = vpop.xlane.xlu0 %891 }
 0x688   : > { %v895_v60 = vpop.xlane.xlu1 %894  ;;  %v886_v61 = vpop.xlane.xlu0 %885 }
 0x689   : > { %1714 = vrcp.f32 %v895_v60 }
 0x68a   : > { %1716 = vrcp.f32 %v886_v61 }
 0x68b   : > { %1718 = vrcp.f32 %v892_v59 }
 0x68c   : > { %v889_v0 = vpop.xlane.xlu1 %888  ;;  %v907_v62 = vpop.permute.xlu0 %906 }
 0x68d   : > { %1720 = vrcp.f32 %v889_v0  ;;  %1566 = vmatprep.subr.bf16.mxu1 %v907_v62 }
 0x68e   : > { %1567 = vmatpush3.bf16.msra.mxu1 %v907_v62 }
 0x68f   : > { %1568 = vmatprep.subr.bf16.mxu1 %v909_v58 }
 0x690   : > { %v972_v2 = vpop.permute.xlu1 %971  ;;  %v968_v16 = vpop.permute.xlu0 %967 }
 0x691   : > { %v982_v9 = vsel %vm435_vm0, %v972_v2, 0 }
 0x692   : > { %1569 = vmatpush3.bf16.msra.mxu1 %v909_v58 }
 0x693   : > { %1604 = vmatprep.subr.msk.bf16.mxu1 %vm435_vm0, %v972_v2  ;;  %v1715_v7 = vpop.eup %1714 }
 0x694   : > { %v1717_v63 = vpop.eup %1716  ;;  %v903_v3 = vmul.f32 %v1715_v7, %v1711_v53  ;;  %v974_v24 = vpop.permute.xlu1 %973 }
 0x695   : > { %v1719_v13 = vpop.eup %1718  ;;  %v900_v4 = vmul.f32 %v1717_v63, %v1709_v52  ;;  %v985_v25 = vsel %vm435_vm0, %v974_v24, 0 }
 0x696   : > { %v902_v6 = vmul.f32 %v1719_v13, %v1707_v48 }
 0x697   : > { %v1721_v1 = vpop.eup %1720 }
 0x698   : > { %v901_v5 = vmul.f32 %v1721_v1, %v1713_v56  ;;  %v905_v10 = vpack.c.bf16 %v903_v3, %v902_v6  ;;  %v970_v26 = vpop.permute.xlu1 %969 }
 0x69a   : > { %v904_v8 = vpack.c.bf16 %v901_v5, %v900_v4 }
 0x69c   : > { %1570 = vmatprep.mubr.msk.bf16.mxu1 %vm394_vm2, %v904_v8 }
 0x69d   : > { %1571 = vmatmul.mubr.msk.bf16.vlgmr.msra.gmra.mrb[8].mxu1 %vm394_vm2, %v905_v10  ;;  %v1673_v10 = vld [vmem:[%s2065_s4 + $0x8] sm:$0xff]  }
 0x69e   : > { %1575 = vmatpush3.bf16.xpose.msra.mxu1 %v982_v9  ;;  %1578 = vmatprep.mubr.msk.bf16.mxu1 %vm435_vm0, %v968_v16  ;;  %v1672_v9 = vld [vmem:[%s2065_s4] sm:$0xff]  }
 0x69f   : > { %1605 = vmatprep.subr.msk.bf16.mxu1 %vm435_vm0, %v974_v24  ;;  %v1768_v24 = vmov 0.0  }
 0x6a0   : > { %397 = vst.msk [vmem:[#allocation2 + $0x10] sm:$0xff] %vm394_vm2, %v1768_v24  ;;  %395 = vst.msk [vmem:[#allocation2] sm:$0xff] %vm394_vm2, %v1768_v24 }
 0x6a1   : > { %396 = vst.msk [vmem:[#allocation2 + $0x8] sm:$0xff] %vm394_vm2, %v1768_v24  ;;  %398 = vst.msk [vmem:[#allocation2 + $0x18] sm:$0xff] %vm394_vm2, %v1768_v24 }
 0x6a6   : > { %1577 = vmatpush3.bf16.xpose.msra.mxu1 %v985_v25 }
 0x6ad   : > { %1579 = vmatmul.mubr.msk.bf16.vlgmr.msra.gmra.mrb[12].mxu1 %vm435_vm0, %v970_v26 }
 0x770   : > { %v1572_v27 = vpop.f32.mrb[8].mxu1 }
 0x771   : > { %v952_v28 = vpop.f32.mrb[9].mxu1 }
 0x772   : > { %v1573_v29 = vpop.f32.mrb[10].mxu1 }
 0x773   : > { %v1653_v30 = vpack.i.bf16 %v1573_v29, %v1572_v27  ;;  %v955_v31 = vpop.f32.mrb[11].mxu1 }
 0x774   : > { %v1648_v32 = vpack.i.bf16 %v955_v31, %v952_v28 }
 0x780   : > { %v1580_v33 = vpop.f32.mrb[12].mxu1 }
 0x781   : > { %v1021_v34 = vpop.f32.mrb[13].mxu1  ;;  %v1030_v38 = vadd.f32 %v1580_v33, %v1856_v17 }
 0x782   : > { %v1022_v35 = vadd.f32 %v1021_v34, %v1856_v17  ;;  %v1581_v36 = vpop.f32.mrb[14].mxu1 }
 0x783   : > { %v1024_v37 = vpop.f32.mrb[15].mxu1  ;;  %v1033_v42 = vadd.f32 %v1581_v36, %v1856_v17  ;;  %v1042_v43 = vsel %vm394_vm2, %v1030_v38, -inf }
 0x784   : > { %v1025_v39 = vadd.f32 %v1024_v37, %v1856_v17  ;;  %v1036_v40 = vsel %vm394_vm2, %v1022_v35, -inf }
 0x785   : > { %1037 = vmax.xlane.f32.xlu0 %v1036_v40  ;;  %v1045_v44 = vsel %vm394_vm2, %v1033_v42, -inf }
 0x786   : > { %v1039_v41 = vsel %vm394_vm2, %v1025_v39, -inf }
 0x787   : > { %1040 = vmax.xlane.f32.xlu1 %v1039_v41 }
 0x789   : > { %1043 = vmax.xlane.f32.xlu0 %v1042_v43 }
 0x78d   : > { %1046 = vmax.xlane.f32.xlu0 %v1045_v44 }
 0x812   : > { %v1038_v45 = vpop.xlane.xlu0 %1037 }
 0x813   : > { %v1048_v46 = vsub.f32 %v1022_v35, %v1038_v45 }
 0x814   : > { %v1041_v47 = vpop.xlane.xlu1 %1040 }
 0x815   : > { %v1052_v52 = vmul.f32 1.442695, %v1048_v46  ;;  %v1049_v53 = vsub.f32 %v1025_v39, %v1041_v47 }
 0x816   : > { %v1044_v48 = vpop.xlane.xlu0 %1043 }
 0x817   : > { %v1050_v49 = vsub.f32 %v1030_v38, %v1044_v48  ;;  %v1054_v57 = vmul.f32 1.442695, %v1049_v53 }
 0x819   : > { %v1056_v54 = vmul.f32 1.442695, %v1050_v49 }
 0x81a   : > { %v1047_v55 = vpop.xlane.xlu0 %1046 }
 0x81b   : > { %1722 = vpow2.f32 %v1056_v54  ;;  %v1051_v56 = vsub.f32 %v1033_v42, %v1047_v55 }
 0x81c   : > { %1724 = vpow2.f32 %v1052_v52 }
 0x81d   : > { %v1058_v17 = vmul.f32 1.442695, %v1051_v56 }
 0x81f   : > { %1726 = vpow2.f32 %v1058_v17 }
 0x820   : > { %1728 = vpow2.f32 %v1054_v57 }
 0x825   : > { %v1723_v58 = vpop.eup %1722 }
 0x826   : > { %v1066_v59 = vsel %vm394_vm2, %v1723_v58, 0.0  ;;  %v1725_v60 = vpop.eup %1724 }
 0x827   : > { %1067 = vadd.xlane.f32.xlu0 %v1066_v59  ;;  %v1060_v0 = vsel %vm394_vm2, %v1725_v60, 0.0  ;;  %v1207_v59 = vld [vmem:[#allocation2 + $0x10] sm:$0xff] }
 0x829   : > { %v1727_v61 = vpop.eup %1726 }
 0x82a   : > { %v1069_v62 = vsel %vm394_vm2, %v1727_v61, 0.0  ;;  %v1729_v2 = vpop.eup %1728 }
 0x82b   : > { %1061 = vadd.xlane.f32.xlu0 %v1060_v0  ;;  %1070 = vadd.xlane.f32.xlu1 %v1069_v62  ;;  %v1063_v7 = vsel %vm394_vm2, %v1729_v2, 0.0  ;;  %v1208_v0 = vld [vmem:[#allocation2 + $0x18] sm:$0xff] }
 0x82f   : > { %1064 = vadd.xlane.f32.xlu1 %v1063_v7  ;;  %v1206_v7 = vld [vmem:[#allocation2 + $0x8] sm:$0xff] }
 0x840   : > { %1084 = vrot.lane.b32.xlu1 %v1876_v51, %s1765_s14 }
 0x841   : > { %1082 = vrot.lane.b32.xlu0 %v1874_v50, %s1765_s14 }
 0x844   : > { %1639 = vrot.lane.b32.xlu1 %v1638_v23, %s1766_s15 }
 0x845   : > { %1649 = vrot.lane.b32.xlu0 %v1648_v32, %s1767_s16 }
 0x848   : > { %1644 = vrot.lane.b32.xlu1 %v1643_v21, %s1766_s15 }
 0x84c   : > { %1654 = vrot.lane.b32.xlu1 %v1653_v30, %s1767_s16 }
 0x8b4   : > { %v1068_v63 = vpop.xlane.xlu0 %1067 }
 0x8b8   : > { %v1071_v13 = vpop.xlane.xlu1 %1070  ;;  %v1062_v1 = vpop.xlane.xlu0 %1061 }
 0x8b9   : > { %1730 = vrcp.f32 %v1071_v13 }
 0x8ba   : > { %1732 = vrcp.f32 %v1062_v1 }
 0x8bb   : > { %1734 = vrcp.f32 %v1068_v63 }
 0x8bc   : > { %v1065_v51 = vpop.xlane.xlu1 %1064  ;;  %v1083_v50 = vpop.permute.xlu0 %1082 }
 0x8bd   : > { %1736 = vrcp.f32 %v1065_v51  ;;  %1582 = vmatprep.subr.bf16.mxu0 %v1083_v50 }
 0x8be   : > { %1583 = vmatpush3.bf16.msra.mxu0 %v1083_v50 }
 0x8c0   : > { %v1085_v19 = vpop.permute.xlu1 %1084  ;;  %v1650_v33 = vpop.permute.xlu0 %1649 }
 0x8c1   : > { %1584 = vmatprep.subr.bf16.mxu0 %v1085_v19  ;;  %v1652_v40 = vunpack.i.h.bf16 %v1650_v33  ;;  %v1651_v41 = vunpack.i.l.bf16 %v1650_v33 }
 0x8c2   : > { %1585 = vmatpush3.bf16.msra.mxu0 %v1085_v19  ;;  %v1487_v19 = vld [vmem:[%s2066_s5] ss:$0 sm:$0xff] }
 0x8c3   : > { %v1731_v22 = vpop.eup %1730  ;;  %1590 = vmatprep.subr.bf16.mxu0 %v1672_v9 }
 0x8c4   : > { %v1733_v23 = vpop.eup %1732  ;;  %v1079_v20 = vmul.f32 %v1731_v22, %v1727_v61  ;;  %v1640_v30 = vpop.permute.xlu1 %1639 }
 0x8c5   : > { %v1735_v3 = vpop.eup %1734  ;;  %v1076_v21 = vmul.f32 %v1733_v23, %v1725_v60  ;;  %v1642_v34 = vunpack.i.h.bf16 %v1640_v30  ;;  %v1641_v35 = vunpack.i.l.bf16 %v1640_v30  ;;  %v1205_v60 = vld [vmem:[#allocation2] sm:$0xff] }
 0x8c6   : > { %v1078_v5 = vmul.f32 %v1735_v3, %v1723_v58  ;;  %v1308_v23 = vld [vmem:[%s374_s29] sm:$0xff] }
 0x8c7   : > { %v1737_v18 = vpop.eup %1736  ;;  %v1192_v42 = vsel %vm435_vm0, %v1904_v15, %v1642_v34  ;;  %v1191_v43 = vsel %vm435_vm0, %v1900_v12, %v1641_v35 }
 0x8c8   : > { %v1077_v4 = vmul.f32 %v1737_v18, %v1729_v2  ;;  %v1081_v8 = vpack.c.bf16 %v1079_v20, %v1078_v5  ;;  %v1645_v31 = vpop.permute.xlu1 %1644  ;;  %v1196_v56 = vsel %vm1195_vm3, %v1191_v43, %v1651_v41 }
 0x8c9   : > { %v1647_v36 = vunpack.i.h.bf16 %v1645_v31  ;;  %v1646_v37 = vunpack.i.l.bf16 %v1645_v31 }
 0x8ca   : > { %v1080_v6 = vpack.c.bf16 %v1077_v4, %v1076_v21  ;;  %v1309_v21 = vld [vmem:[%s374_s29 + $0x8] sm:$0xff] }
 0x8cb   : > { %v1194_v45 = vsel %vm435_vm0, %v1902_v14, %v1647_v36  ;;  %v1193_v46 = vsel %vm435_vm0, %v1898_v11, %v1646_v37  ;;  %v1197_v14 = vsel %vm1195_vm3, %v1192_v42, %v1652_v40 }
 0x8cc   : > { %1586 = vmatprep.mubr.msk.bf16.mxu0 %vm394_vm2, %v1080_v6  ;;  %v1655_v32 = vpop.permute.xlu1 %1654  ;;  %v1310_v6 = vld [vmem:[%s374_s29 + $0x10] sm:$0xff] }
 0x8cd   : > { %1587 = vmatmul.mubr.msk.bf16.vlgmr.msra.gmra.mrb[12].mxu0 %vm394_vm2, %v1081_v8  ;;  %v1657_v38 = vunpack.i.h.bf16 %v1655_v32  ;;  %v1656_v39 = vunpack.i.l.bf16 %v1655_v32 }
 0x8ce   : > { %1591 = vmatpush3.bf16.msra.mxu0 %v1672_v9 }
 0x8cf   : > { %1592 = vmatprep.subr.bf16.mxu0 %v1673_v10  ;;  %v1198_v52 = vsel %vm1195_vm3, %v1193_v46, %v1656_v39  ;;  %v1199_v53 = vsel %vm1195_vm3, %v1194_v45, %v1657_v38 }
 0x8d2   : > { %1593 = vmatpush3.bf16.msra.mxu0 %v1673_v10 }
 0x9a0   : > { %v1588_v16 = vpop.f32.mrb[12].mxu0 }
 0x9a1   : > { %v1128_v25 = vpop.f32.mrb[13].mxu0 }
 0x9a2   : > { %v1589_v26 = vpop.f32.mrb[14].mxu0 }
 0x9a3   : > { %v1663_v27 = vpack.i.bf16 %v1589_v26, %v1588_v16  ;;  %v1131_v28 = vpop.f32.mrb[15].mxu0  ;;  %v1311_v16 = vld [vmem:[%s374_s29 + $0x18] sm:$0xff] }
 0x9a4   : > { %v1658_v29 = vpack.i.bf16 %v1131_v28, %v1128_v25 }
 0x9a5   : > { %1664 = vrot.lane.b32.xlu1 %v1663_v27, %s1769_s21 }
 0x9a6   : > { %1659 = vrot.lane.b32.xlu0 %v1658_v29, %s1769_s21 }
 0xa17   : > { %v1665_v44 = vpop.permute.xlu1 %1664 }
 0xa18   : > { %v1667_v47 = vunpack.i.h.bf16 %v1665_v44  ;;  %v1666_v48 = vunpack.i.l.bf16 %v1665_v44  ;;  %v1660_v49 = vpop.permute.xlu0 %1659 }
 0xa19   : > { %v1662_v54 = vunpack.i.h.bf16 %v1660_v49  ;;  %v1661_v15 = vunpack.i.l.bf16 %v1660_v49 }
 0xa1a   : > { %v1204_v55 = vsel %vm1200_vm4, %v1199_v53, %v1667_v47  ;;  %v1203_v12 = vsel %vm1200_vm4, %v1198_v52, %v1666_v48 }
 0xa1b   : > { %v1210_v57 = vpack.c.bf16 %v1204_v55, %v1203_v12  ;;  %v1201_v11 = vsel %vm1200_vm4, %v1196_v56, %v1661_v15  ;;  %v1202_v17 = vsel %vm1200_vm4, %v1197_v14, %v1662_v54 }
 0xa1c   : > { %v1209_v58 = vpack.c.bf16 %v1202_v17, %v1201_v11 }
 0xa1e   : > { %1594 = vmatprep.mubr.msk.bf16.mxu0 %vm394_vm2, %v1209_v58 }
 0xa1f   : > { %1595 = vmatmul.mubr.msk.bf16.vlgmr.msra.gmra.mrb[16].mxu0 %vm394_vm2, %v1210_v57 }
 0xaf2   : > { %v1596_v61 = vpop.f32.mrb[16].mxu0 }
 0xaf3   : > { %v1284_v62 = vadd.f32 %v1596_v61, %v1207_v59  ;;  %v1267_v2 = vpop.f32.mrb[17].mxu0 }
 0xaf4   : > { %v1282_v63 = vadd.f32 %v1267_v2, %v1205_v60  ;;  %v1597_v13 = vpop.f32.mrb[18].mxu0 }
 0xaf5   : > { %1288 = vst.msk [vmem:[#allocation2 + $0x10] sm:$0xff] %vm394_vm2, %v1284_v62  ;;  %v1285_v1 = vadd.f32 %v1597_v13, %v1208_v0  ;;  %v1270_v51 = vpop.f32.mrb[19].mxu0 }
 0xaf6   : > { %1286 = vst.msk [vmem:[#allocation2] sm:$0xff] %vm394_vm2, %v1282_v63  ;;  %v1283_v50 = vadd.f32 %v1270_v51, %v1206_v7 }
 0xaf7   : > { %1289 = vst.msk [vmem:[#allocation2 + $0x18] sm:$0xff] %vm394_vm2, %v1285_v1 }
 0xaf8   : > { %1287 = vst.msk [vmem:[#allocation2 + $0x8] sm:$0xff] %vm394_vm2, %v1283_v50 }
 0xafc   : > { %v1295_v22 = vld [vmem:[#allocation2 + $0x10] sm:$0xff] }
 0xafd   : > { %v1293_v3 = vld [vmem:[#allocation2] sm:$0xff]  ;;  %v1306_v4 = vadd.f32 %v1487_v19, %v1295_v22 }
 0xafe   : > { %v1304_v18 = vadd.f32 %v1487_v19, %v1293_v3  ;;  %v1296_v20 = vld [vmem:[#allocation2 + $0x18] sm:$0xff] }
 0xaff   : > { %v1294_v5 = vld [vmem:[#allocation2 + $0x8] sm:$0xff]  ;;  %v1307_v9 = vadd.f32 %v1487_v19, %v1296_v20  ;;  %v1314_v25 = vadd.f32 %v1310_v6, %v1306_v4 }
 0xb00   : > { %v1312_v8 = vadd.f32 %v1308_v23, %v1304_v18  ;;  %v1305_v10 = vadd.f32 %v1487_v19, %v1294_v5 }
 0xb01   : > { %v1315_v26 = vadd.f32 %v1311_v16, %v1307_v9  ;;  %1318 = vst.msk [vmem:[%s386_s25 + $0x10] sm:$0xff] %vm394_vm2, %v1314_v25 }
 0xb02   : > { %1316 = vst.msk [vmem:[%s386_s25] sm:$0xff] %vm394_vm2, %v1312_v8  ;;  %v1313_v24 = vadd.f32 %v1309_v21, %v1305_v10 }
 0xb03   : > { %1319 = vst.msk [vmem:[%s386_s25 + $0x18] sm:$0xff] %vm394_vm2, %v1315_v26 }
 0xb04   : > { %1317 = vst.msk [vmem:[%s386_s25 + $0x8] sm:$0xff] %vm394_vm2, %v1313_v24 }
 0xb05 PF: > { %s16_s23 = sadd.s32 1, %s1760_s23   ;;  %s2068_s21 = smov %s1756_s22 }
 0xb06   : > { %p13_p5 = scmp.ge.s32.totalorder %s16_s23, 4   ;;  %s2069_s22 = smov %s2071_s24 }
 0xb08   :  { %15 = sbr.rel (!%p13_p5) target bundleno = 2 (0x2), region = 94 }

</bundles_post_ra>
